<compile_context>
chip_gen: v5e
topology: v5e:2x2
jax: 0.10.0
libtpu: 0.0.40
codegen_flags: <defaults>
</compile_context>

<pallas_src>
import jax
import jax.numpy as jnp
from jax.experimental import pallas as pl
from jax.experimental.pallas import tpu as pltpu


# Tile-aligned placement of each image inside the zero-filled VMEM scratch.
# x lives at rows [_R0, _R0+H) and cols [_C0, _C0+W); the 1-element zero
# border needed by p=1 padding sits at rows/cols (_R0-1, _R0+H), (_C0-1, _C0+W).
_R0 = 8      # one f32 sublane tile
_C0 = 128    # one lane tile


# ------------------------------ Pallas kernel -------------------------------

def _critic_fused_kernel(cw_ref, cb_ref, fb_ref, x_ref, fw_ref, v_ref, xp_ref):
    """Fused conv(2x2,s=1,p=1) + ReLU + NCHW-flatten + fc1 for ALL batch rows.

    cw_ref: SMEM (C*4,)         conv weight, flat index c*4 + kh*2 + kw
    cb_ref: SMEM (C,)           conv bias
    fb_ref: SMEM (1,)           fc1 bias
    x_ref : VMEM (B, 1, H, W)   raw NCHW input (single input channel)
    fw_ref: VMEM (C, OH, OW)    fc1 weight reshaped in NCHW-flatten order
    v_ref : VMEM (B, 1, 1)      critic values
    xp_ref: VMEM (B, SR, SC)    zero-padded staging scratch
    """
    B = x_ref.shape[0]
    H, W = x_ref.shape[2], x_ref.shape[3]
    C, OH, OW = fw_ref.shape

    # In-kernel padding: zero the scratch once; the p=1 border is implicit.
    xp_ref[...] = jnp.zeros_like(xp_ref)

    # Hoist SMEM scalar reads and fc1-weight slab loads once, shared across
    # batch rows and conv taps.
    w = [cw_ref[i] for i in range(4 * C)]
    cb = [cb_ref[c] for c in range(C)]
    fb = fb_ref[0]
    fw = [fw_ref[c] for c in range(C)]            # (OH, OW) fc1 weight slabs

    r0, r1 = _R0 - 1, _R0 - 1 + OH                # tap window rows
    c0, c1 = _C0 - 1, _C0 - 1 + OW                # tap window cols

    for b in range(B):                            # static unroll; B is tiny
        # Drop this image in at the tile-aligned offset (aligned store).
        xp_ref[b, _R0:_R0 + H, _C0:_C0 + W] = x_ref[b, 0, :, :]
        zb = xp_ref[b]                            # (SR, SC) padded slab

        # Four taps of the 2x2 / stride-1 conv: overlapping shifted windows
        # of the padded slab (pure VPU/XLU work, no MXU, no patch matrix).
        s00 = zb[r0:r1, c0:c1]
        s01 = zb[r0:r1, c0 + 1:c1 + 1]
        s10 = zb[r0 + 1:r1 + 1, c0:c1]
        s11 = zb[r0 + 1:r1 + 1, c0 + 1:c1 + 1]

        acc = jnp.zeros((OH, OW), jnp.float32)
        for c in range(C):                        # static unroll (C is tiny)
            y = (w[4 * c + 0] * s00 + w[4 * c + 1] * s01 +
                 w[4 * c + 2] * s10 + w[4 * c + 3] * s11 + cb[c])
            y = jnp.maximum(y, 0.0)               # ReLU(conv), (OH, OW)
            acc = acc + y * fw[c]                 # fc1 partial products

        # fc1 reduction over (c, oh, ow) + bias -> one scalar per batch row.
        r = jnp.sum(acc, axis=1, keepdims=True)   # (OH, 1) lane reduce
        v = jnp.sum(r, axis=0, keepdims=True)     # (1, 1)  sublane reduce
        v_ref[b] = v + fb


# -------------------------------- wrapper -----------------------------------

def _scratch_dims(H, W):
    SR = ((_R0 + H + 1 + 7) // 8) * 8             # >= _R0 + H + 1, 8-aligned
    SC = ((_C0 + W + 1 + 127) // 128) * 128       # >= _C0 + W + 1, 128-aligned
    return SR, SC


@jax.jit
def critic_conv_forward(x_nchw, params):
    """CriticConv forward: x (B, 1, H, W) -> value (B, 1)."""
    B, _, H, W = x_nchw.shape
    OH, OW = H + 1, W + 1                         # conv output (k=2, s=1, p=1)
    C = params["fc1_wm"].shape[0]
    SR, SC = _scratch_dims(H, W)

    # Tiny custom call (~25 KFLOPs, ~7 KB) — tell XLA so it schedules freely.
    cost = pl.CostEstimate(
        flops=int(B * C * OH * OW * 11),
        transcendentals=0,
        bytes_accessed=int(x_nchw.size * 4 + C * OH * OW * 4
                           + (5 * C + 1) * 4 + B * 4),
    )

    v = pl.pallas_call(
        _critic_fused_kernel,
        out_shape=jax.ShapeDtypeStruct((B, 1, 1), jnp.float32),
        in_specs=[
            pl.BlockSpec(memory_space=pltpu.MemorySpace.SMEM),   # conv w flat
            pl.BlockSpec(memory_space=pltpu.MemorySpace.SMEM),   # conv b
            pl.BlockSpec(memory_space=pltpu.MemorySpace.SMEM),   # fc1 b
            pl.BlockSpec(memory_space=pltpu.MemorySpace.VMEM),   # x (B,1,H,W)
            pl.BlockSpec(memory_space=pltpu.MemorySpace.VMEM),   # fc1 w slabs
        ],
        out_specs=pl.BlockSpec(memory_space=pltpu.MemorySpace.VMEM),
        scratch_shapes=[pltpu.VMEM((B, SR, SC), jnp.float32)],
        cost_estimate=cost,
    )(params["conv_w_flat"], params["conv_b"], params["fc1_b"],
      x_nchw, params["fc1_wm"])
    return v.reshape(B, 1)


# --------------------------- pure-JAX reference ------------------------------

def reference_forward(x_nchw, params):
    hp = jax.lax.Precision.HIGHEST
    y = jax.lax.conv_general_dilated(
        x_nchw, params["conv_w"], (1, 1), [(1, 1), (1, 1)],
        dimension_numbers=("NCHW", "OIHW", "NCHW"), precision=hp)
    y = jax.nn.relu(y + params["conv_b"][None, :, None, None])
    feat = y.reshape(x_nchw.shape[0], -1)                     # NCHW flatten
    return jnp.dot(feat, params["fc1_w"].T, precision=hp) + params["fc1_b"]


# ---------------------------------- main -------------------------------------

if __name__ == "__main__":
    # CriticConv(input_height=16, input_width=16, channel=4); batch = 2,
    # single input channel (conv = Conv2d(1, channel, k=2, s=1, p=1)).
    B, H, W, channel = 2, 16, 16, 4
    OH, OW = H + 1, W + 1                         # calc_cnn_size(16,2,1,1)=17
    fc_in = channel * OH * OW                     # 1156 (see NOTE above)

    key = jax.random.PRNGKey(0)
    k1, k2, k3, k4, kx = jax.random.split(key, 5)

    conv_w = 0.01 * jax.random.normal(k1, (channel, 1, 2, 2), jnp.float32)
    conv_b = 0.01 * jax.random.normal(k2, (channel,), jnp.float32)
    fc1_w = 0.01 * jax.random.normal(k3, (1, fc_in), jnp.float32)
    fc1_b = 0.01 * jax.random.normal(k4, (1,), jnp.float32)

    params = {
        # original PyTorch-layout parameters (used by the reference)
        "conv_w": conv_w,
        "conv_b": conv_b,
        "fc1_w": fc1_w,
        "fc1_b": fc1_b,
        # kernel-layout parameters (prepared once, outside the forward)
        "conv_w_flat": conv_w.reshape(channel * 4),   # idx = c*4 + kh*2 + kw
        "fc1_wm": fc1_w.reshape(channel, OH, OW),     # NCHW flatten folded in
    }

    x = jax.random.normal(kx, (B, 1, H, W), jnp.float32)

    v = critic_conv_forward(x, params)
    jax.block_until_ready(v)

    v_ref = reference_forward(x, params)
    assert v.shape == (B, 1)
    assert jnp.allclose(v, v_ref, atol=1e-5, rtol=1e-5), (v, v_ref)

    print("KERNEL_OK")
</pallas_src>

<mosaic_0001>
module attributes {stable_mosaic.version = 11 : i64} {
  func.func @_critic_fused_kernel(%arg0: memref<16xf32, #tpu.memory_space<smem>>, %arg1: memref<4xf32, #tpu.memory_space<smem>>, %arg2: memref<1xf32, #tpu.memory_space<smem>>, %arg3: memref<2x1x16x16xf32, #tpu.memory_space<vmem>>, %arg4: memref<4x17x17xf32, #tpu.memory_space<vmem>>, %arg5: memref<2x1x1xf32, #tpu.memory_space<vmem>>, %arg6: memref<2x32x256xf32, #tpu.memory_space<vmem>>) attributes {dimension_semantics = [], scalar_prefetch = 0 : i64, scratch_operands = 1 : i64, tpu.core_type = #tpu.core_type<tc>} {
    %cst = arith.constant 0.000000e+00 : f32
    %0 = vector.broadcast %cst : f32 to vector<2x32x256xf32>
    %c0 = arith.constant 0 : index
    %c0_0 = arith.constant 0 : index
    %c0_1 = arith.constant 0 : index
    %1 = vector.load %arg6[%c0, %c0_0, %c0_1] : memref<2x32x256xf32, #tpu.memory_space<vmem>>, vector<2x32x256xf32>
    tpu.vector_store %arg6[%c0, %c0_0, %c0_1], %0 {strides = array<i32>} : memref<2x32x256xf32, #tpu.memory_space<vmem>>, vector<2x32x256xf32>,
    %c0_2 = arith.constant 0 : index
    %2 = memref.load %arg0[%c0_2] : memref<16xf32, #tpu.memory_space<smem>>
    %c1 = arith.constant 1 : index
    %3 = memref.load %arg0[%c1] : memref<16xf32, #tpu.memory_space<smem>>
    %c2 = arith.constant 2 : index
    %4 = memref.load %arg0[%c2] : memref<16xf32, #tpu.memory_space<smem>>
    %c3 = arith.constant 3 : index
    %5 = memref.load %arg0[%c3] : memref<16xf32, #tpu.memory_space<smem>>
    %c4 = arith.constant 4 : index
    %6 = memref.load %arg0[%c4] : memref<16xf32, #tpu.memory_space<smem>>
    %c5 = arith.constant 5 : index
    %7 = memref.load %arg0[%c5] : memref<16xf32, #tpu.memory_space<smem>>
    %c6 = arith.constant 6 : index
    %8 = memref.load %arg0[%c6] : memref<16xf32, #tpu.memory_space<smem>>
    %c7 = arith.constant 7 : index
    %9 = memref.load %arg0[%c7] : memref<16xf32, #tpu.memory_space<smem>>
    %c8 = arith.constant 8 : index
    %10 = memref.load %arg0[%c8] : memref<16xf32, #tpu.memory_space<smem>>
    %c9 = arith.constant 9 : index
    %11 = memref.load %arg0[%c9] : memref<16xf32, #tpu.memory_space<smem>>
    %c10 = arith.constant 10 : index
    %12 = memref.load %arg0[%c10] : memref<16xf32, #tpu.memory_space<smem>>
    %c11 = arith.constant 11 : index
    %13 = memref.load %arg0[%c11] : memref<16xf32, #tpu.memory_space<smem>>
    %c12 = arith.constant 12 : index
    %14 = memref.load %arg0[%c12] : memref<16xf32, #tpu.memory_space<smem>>
    %c13 = arith.constant 13 : index
    %15 = memref.load %arg0[%c13] : memref<16xf32, #tpu.memory_space<smem>>
    %c14 = arith.constant 14 : index
    %16 = memref.load %arg0[%c14] : memref<16xf32, #tpu.memory_space<smem>>
    %c15 = arith.constant 15 : index
    %17 = memref.load %arg0[%c15] : memref<16xf32, #tpu.memory_space<smem>>
    %c0_3 = arith.constant 0 : index
    %18 = memref.load %arg1[%c0_3] : memref<4xf32, #tpu.memory_space<smem>>
    %c1_4 = arith.constant 1 : index
    %19 = memref.load %arg1[%c1_4] : memref<4xf32, #tpu.memory_space<smem>>
    %c2_5 = arith.constant 2 : index
    %20 = memref.load %arg1[%c2_5] : memref<4xf32, #tpu.memory_space<smem>>
    %c3_6 = arith.constant 3 : index
    %21 = memref.load %arg1[%c3_6] : memref<4xf32, #tpu.memory_space<smem>>
    %c0_7 = arith.constant 0 : index
    %22 = memref.load %arg2[%c0_7] : memref<1xf32, #tpu.memory_space<smem>>
    %c0_8 = arith.constant 0 : index
    %c0_9 = arith.constant 0 : index
    %c0_10 = arith.constant 0 : index
    %23 = vector.load %arg4[%c0_8, %c0_9, %c0_10] : memref<4x17x17xf32, #tpu.memory_space<vmem>>, vector<1x17x17xf32>
    %24 = vector.shape_cast %23 : vector<1x17x17xf32> to vector<17x17xf32>
    %c1_11 = arith.constant 1 : index
    %c0_12 = arith.constant 0 : index
    %c0_13 = arith.constant 0 : index
    %25 = vector.load %arg4[%c1_11, %c0_12, %c0_13] : memref<4x17x17xf32, #tpu.memory_space<vmem>>, vector<1x17x17xf32>
    %26 = vector.shape_cast %25 : vector<1x17x17xf32> to vector<17x17xf32>
    %c2_14 = arith.constant 2 : index
    %c0_15 = arith.constant 0 : index
    %c0_16 = arith.constant 0 : index
    %27 = vector.load %arg4[%c2_14, %c0_15, %c0_16] : memref<4x17x17xf32, #tpu.memory_space<vmem>>, vector<1x17x17xf32>
    %28 = vector.shape_cast %27 : vector<1x17x17xf32> to vector<17x17xf32>
    %c3_17 = arith.constant 3 : index
    %c0_18 = arith.constant 0 : index
    %c0_19 = arith.constant 0 : index
    %29 = vector.load %arg4[%c3_17, %c0_18, %c0_19] : memref<4x17x17xf32, #tpu.memory_space<vmem>>, vector<1x17x17xf32>
    %30 = vector.shape_cast %29 : vector<1x17x17xf32> to vector<17x17xf32>
    %c0_20 = arith.constant 0 : index
    %c0_21 = arith.constant 0 : index
    %c0_22 = arith.constant 0 : index
    %c0_23 = arith.constant 0 : index
    %31 = vector.load %arg3[%c0_20, %c0_21, %c0_22, %c0_23] : memref<2x1x16x16xf32, #tpu.memory_space<vmem>>, vector<1x1x16x16xf32>
    %32 = vector.shape_cast %31 : vector<1x1x16x16xf32> to vector<16x16xf32>
    %c0_24 = arith.constant 0 : index
    %c8_25 = arith.constant 8 : index
    %c128 = arith.constant 128 : index
    %33 = vector.load %arg6[%c0_24, %c8_25, %c128] : memref<2x32x256xf32, #tpu.memory_space<vmem>>, vector<1x16x16xf32>
    %34 = vector.shape_cast %33 : vector<1x16x16xf32> to vector<16x16xf32>
    %35 = vector.shape_cast %32 : vector<16x16xf32> to vector<1x16x16xf32>
    tpu.vector_store %arg6[%c0_24, %c8_25, %c128], %35 {strides = array<i32>} : memref<2x32x256xf32, #tpu.memory_space<vmem>>, vector<1x16x16xf32>,
    %c0_26 = arith.constant 0 : index
    %c0_27 = arith.constant 0 : index
    %c0_28 = arith.constant 0 : index
    %36 = vector.load %arg6[%c0_26, %c0_27, %c0_28] : memref<2x32x256xf32, #tpu.memory_space<vmem>>, vector<1x32x256xf32>
    %37 = vector.shape_cast %36 : vector<1x32x256xf32> to vector<32x256xf32>
    %38 = vector.extract_strided_slice %37 {offsets = [7, 127], sizes = [17, 17], strides = [1, 1]} : vector<32x256xf32> to vector<17x17xf32>
    %39 = vector.extract_strided_slice %37 {offsets = [7, 128], sizes = [17, 17], strides = [1, 1]} : vector<32x256xf32> to vector<17x17xf32>
    %40 = vector.extract_strided_slice %37 {offsets = [8, 127], sizes = [17, 17], strides = [1, 1]} : vector<32x256xf32> to vector<17x17xf32>
    %41 = vector.extract_strided_slice %37 {offsets = [8, 128], sizes = [17, 17], strides = [1, 1]} : vector<32x256xf32> to vector<17x17xf32>
    %cst_29 = arith.constant 0.000000e+00 : f32
    %42 = vector.broadcast %cst_29 : f32 to vector<17x17xf32>
    %43 = vector.broadcast %2 : f32 to vector<17x17xf32>
    %44 = arith.mulf %43, %38 : vector<17x17xf32>
    %45 = vector.broadcast %3 : f32 to vector<17x17xf32>
    %46 = arith.mulf %45, %39 : vector<17x17xf32>
    %47 = arith.addf %44, %46 : vector<17x17xf32>
    %48 = vector.broadcast %4 : f32 to vector<17x17xf32>
    %49 = arith.mulf %48, %40 : vector<17x17xf32>
    %50 = arith.addf %47, %49 : vector<17x17xf32>
    %51 = vector.broadcast %5 : f32 to vector<17x17xf32>
    %52 = arith.mulf %51, %41 : vector<17x17xf32>
    %53 = arith.addf %50, %52 : vector<17x17xf32>
    %54 = vector.broadcast %18 : f32 to vector<17x17xf32>
    %55 = arith.addf %53, %54 : vector<17x17xf32>
    %cst_30 = arith.constant 0.000000e+00 : f32
    %56 = vector.broadcast %cst_30 : f32 to vector<17x17xf32>
    %57 = arith.maximumf %55, %56 : vector<17x17xf32>
    %58 = arith.mulf %57, %24 : vector<17x17xf32>
    %59 = arith.addf %42, %58 : vector<17x17xf32>
    %60 = vector.broadcast %6 : f32 to vector<17x17xf32>
    %61 = arith.mulf %60, %38 : vector<17x17xf32>
    %62 = vector.broadcast %7 : f32 to vector<17x17xf32>
    %63 = arith.mulf %62, %39 : vector<17x17xf32>
    %64 = arith.addf %61, %63 : vector<17x17xf32>
    %65 = vector.broadcast %8 : f32 to vector<17x17xf32>
    %66 = arith.mulf %65, %40 : vector<17x17xf32>
    %67 = arith.addf %64, %66 : vector<17x17xf32>
    %68 = vector.broadcast %9 : f32 to vector<17x17xf32>
    %69 = arith.mulf %68, %41 : vector<17x17xf32>
    %70 = arith.addf %67, %69 : vector<17x17xf32>
    %71 = vector.broadcast %19 : f32 to vector<17x17xf32>
    %72 = arith.addf %70, %71 : vector<17x17xf32>
    %cst_31 = arith.constant 0.000000e+00 : f32
    %73 = vector.broadcast %cst_31 : f32 to vector<17x17xf32>
    %74 = arith.maximumf %72, %73 : vector<17x17xf32>
    %75 = arith.mulf %74, %26 : vector<17x17xf32>
    %76 = arith.addf %59, %75 : vector<17x17xf32>
    %77 = vector.broadcast %10 : f32 to vector<17x17xf32>
    %78 = arith.mulf %77, %38 : vector<17x17xf32>
    %79 = vector.broadcast %11 : f32 to vector<17x17xf32>
    %80 = arith.mulf %79, %39 : vector<17x17xf32>
    %81 = arith.addf %78, %80 : vector<17x17xf32>
    %82 = vector.broadcast %12 : f32 to vector<17x17xf32>
    %83 = arith.mulf %82, %40 : vector<17x17xf32>
    %84 = arith.addf %81, %83 : vector<17x17xf32>
    %85 = vector.broadcast %13 : f32 to vector<17x17xf32>
    %86 = arith.mulf %85, %41 : vector<17x17xf32>
    %87 = arith.addf %84, %86 : vector<17x17xf32>
    %88 = vector.broadcast %20 : f32 to vector<17x17xf32>
    %89 = arith.addf %87, %88 : vector<17x17xf32>
    %cst_32 = arith.constant 0.000000e+00 : f32
    %90 = vector.broadcast %cst_32 : f32 to vector<17x17xf32>
    %91 = arith.maximumf %89, %90 : vector<17x17xf32>
    %92 = arith.mulf %91, %28 : vector<17x17xf32>
    %93 = arith.addf %76, %92 : vector<17x17xf32>
    %94 = vector.broadcast %14 : f32 to vector<17x17xf32>
    %95 = arith.mulf %94, %38 : vector<17x17xf32>
    %96 = vector.broadcast %15 : f32 to vector<17x17xf32>
    %97 = arith.mulf %96, %39 : vector<17x17xf32>
    %98 = arith.addf %95, %97 : vector<17x17xf32>
    %99 = vector.broadcast %16 : f32 to vector<17x17xf32>
    %100 = arith.mulf %99, %40 : vector<17x17xf32>
    %101 = arith.addf %98, %100 : vector<17x17xf32>
    %102 = vector.broadcast %17 : f32 to vector<17x17xf32>
    %103 = arith.mulf %102, %41 : vector<17x17xf32>
    %104 = arith.addf %101, %103 : vector<17x17xf32>
    %105 = vector.broadcast %21 : f32 to vector<17x17xf32>
    %106 = arith.addf %104, %105 : vector<17x17xf32>
    %cst_33 = arith.constant 0.000000e+00 : f32
    %107 = vector.broadcast %cst_33 : f32 to vector<17x17xf32>
    %108 = arith.maximumf %106, %107 : vector<17x17xf32>
    %109 = arith.mulf %108, %30 : vector<17x17xf32>
    %110 = arith.addf %93, %109 : vector<17x17xf32>
    %cst_34 = arith.constant dense<0.000000e+00> : vector<17xf32>
    %111 = vector.multi_reduction <add>, %110, %cst_34 [1] : vector<17x17xf32> to vector<17xf32>
    %112 = vector.shape_cast %111 : vector<17xf32> to vector<17x1xf32>
    %cst_35 = arith.constant dense<0.000000e+00> : vector<1xf32>
    %113 = vector.multi_reduction <add>, %112, %cst_35 [0] : vector<17x1xf32> to vector<1xf32>
    %114 = vector.shape_cast %113 : vector<1xf32> to vector<1x1xf32>
    %115 = vector.broadcast %22 : f32 to vector<1x1xf32>
    %116 = arith.addf %114, %115 : vector<1x1xf32>
    %c0_36 = arith.constant 0 : index
    %c0_37 = arith.constant 0 : index
    %c0_38 = arith.constant 0 : index
    %117 = vector.load %arg5[%c0_36, %c0_37, %c0_38] : memref<2x1x1xf32, #tpu.memory_space<vmem>>, vector<1x1x1xf32>
    %118 = vector.shape_cast %117 : vector<1x1x1xf32> to vector<1x1xf32>
    %119 = vector.shape_cast %116 : vector<1x1xf32> to vector<1x1x1xf32>
    tpu.vector_store %arg5[%c0_36, %c0_37, %c0_38], %119 {strides = array<i32>} : memref<2x1x1xf32, #tpu.memory_space<vmem>>, vector<1x1x1xf32>,
    %c1_39 = arith.constant 1 : index
    %c0_40 = arith.constant 0 : index
    %c0_41 = arith.constant 0 : index
    %c0_42 = arith.constant 0 : index
    %120 = vector.load %arg3[%c1_39, %c0_40, %c0_41, %c0_42] : memref<2x1x16x16xf32, #tpu.memory_space<vmem>>, vector<1x1x16x16xf32>
    %121 = vector.shape_cast %120 : vector<1x1x16x16xf32> to vector<16x16xf32>
    %c1_43 = arith.constant 1 : index
    %c8_44 = arith.constant 8 : index
    %c128_45 = arith.constant 128 : index
    %122 = vector.load %arg6[%c1_43, %c8_44, %c128_45] : memref<2x32x256xf32, #tpu.memory_space<vmem>>, vector<1x16x16xf32>
    %123 = vector.shape_cast %122 : vector<1x16x16xf32> to vector<16x16xf32>
    %124 = vector.shape_cast %121 : vector<16x16xf32> to vector<1x16x16xf32>
    tpu.vector_store %arg6[%c1_43, %c8_44, %c128_45], %124 {strides = array<i32>} : memref<2x32x256xf32, #tpu.memory_space<vmem>>, vector<1x16x16xf32>,
    %c1_46 = arith.constant 1 : index
    %c0_47 = arith.constant 0 : index
    %c0_48 = arith.constant 0 : index
    %125 = vector.load %arg6[%c1_46, %c0_47, %c0_48] : memref<2x32x256xf32, #tpu.memory_space<vmem>>, vector<1x32x256xf32>
    %126 = vector.shape_cast %125 : vector<1x32x256xf32> to vector<32x256xf32>
    %127 = vector.extract_strided_slice %126 {offsets = [7, 127], sizes = [17, 17], strides = [1, 1]} : vector<32x256xf32> to vector<17x17xf32>
    %128 = vector.extract_strided_slice %126 {offsets = [7, 128], sizes = [17, 17], strides = [1, 1]} : vector<32x256xf32> to vector<17x17xf32>
    %129 = vector.extract_strided_slice %126 {offsets = [8, 127], sizes = [17, 17], strides = [1, 1]} : vector<32x256xf32> to vector<17x17xf32>
    %130 = vector.extract_strided_slice %126 {offsets = [8, 128], sizes = [17, 17], strides = [1, 1]} : vector<32x256xf32> to vector<17x17xf32>
    %cst_49 = arith.constant 0.000000e+00 : f32
    %131 = vector.broadcast %cst_49 : f32 to vector<17x17xf32>
    %132 = vector.broadcast %2 : f32 to vector<17x17xf32>
    %133 = arith.mulf %132, %127 : vector<17x17xf32>
    %134 = vector.broadcast %3 : f32 to vector<17x17xf32>
    %135 = arith.mulf %134, %128 : vector<17x17xf32>
    %136 = arith.addf %133, %135 : vector<17x17xf32>
    %137 = vector.broadcast %4 : f32 to vector<17x17xf32>
    %138 = arith.mulf %137, %129 : vector<17x17xf32>
    %139 = arith.addf %136, %138 : vector<17x17xf32>
    %140 = vector.broadcast %5 : f32 to vector<17x17xf32>
    %141 = arith.mulf %140, %130 : vector<17x17xf32>
    %142 = arith.addf %139, %141 : vector<17x17xf32>
    %143 = vector.broadcast %18 : f32 to vector<17x17xf32>
    %144 = arith.addf %142, %143 : vector<17x17xf32>
    %cst_50 = arith.constant 0.000000e+00 : f32
    %145 = vector.broadcast %cst_50 : f32 to vector<17x17xf32>
    %146 = arith.maximumf %144, %145 : vector<17x17xf32>
    %147 = arith.mulf %146, %24 : vector<17x17xf32>
    %148 = arith.addf %131, %147 : vector<17x17xf32>
    %149 = vector.broadcast %6 : f32 to vector<17x17xf32>
    %150 = arith.mulf %149, %127 : vector<17x17xf32>
    %151 = vector.broadcast %7 : f32 to vector<17x17xf32>
    %152 = arith.mulf %151, %128 : vector<17x17xf32>
    %153 = arith.addf %150, %152 : vector<17x17xf32>
    %154 = vector.broadcast %8 : f32 to vector<17x17xf32>
    %155 = arith.mulf %154, %129 : vector<17x17xf32>
    %156 = arith.addf %153, %155 : vector<17x17xf32>
    %157 = vector.broadcast %9 : f32 to vector<17x17xf32>
    %158 = arith.mulf %157, %130 : vector<17x17xf32>
    %159 = arith.addf %156, %158 : vector<17x17xf32>
    %160 = vector.broadcast %19 : f32 to vector<17x17xf32>
    %161 = arith.addf %159, %160 : vector<17x17xf32>
    %cst_51 = arith.constant 0.000000e+00 : f32
    %162 = vector.broadcast %cst_51 : f32 to vector<17x17xf32>
    %163 = arith.maximumf %161, %162 : vector<17x17xf32>
    %164 = arith.mulf %163, %26 : vector<17x17xf32>
    %165 = arith.addf %148, %164 : vector<17x17xf32>
    %166 = vector.broadcast %10 : f32 to vector<17x17xf32>
    %167 = arith.mulf %166, %127 : vector<17x17xf32>
    %168 = vector.broadcast %11 : f32 to vector<17x17xf32>
    %169 = arith.mulf %168, %128 : vector<17x17xf32>
    %170 = arith.addf %167, %169 : vector<17x17xf32>
    %171 = vector.broadcast %12 : f32 to vector<17x17xf32>
    %172 = arith.mulf %171, %129 : vector<17x17xf32>
    %173 = arith.addf %170, %172 : vector<17x17xf32>
    %174 = vector.broadcast %13 : f32 to vector<17x17xf32>
    %175 = arith.mulf %174, %130 : vector<17x17xf32>
    %176 = arith.addf %173, %175 : vector<17x17xf32>
    %177 = vector.broadcast %20 : f32 to vector<17x17xf32>
    %178 = arith.addf %176, %177 : vector<17x17xf32>
    %cst_52 = arith.constant 0.000000e+00 : f32
    %179 = vector.broadcast %cst_52 : f32 to vector<17x17xf32>
    %180 = arith.maximumf %178, %179 : vector<17x17xf32>
    %181 = arith.mulf %180, %28 : vector<17x17xf32>
    %182 = arith.addf %165, %181 : vector<17x17xf32>
    %183 = vector.broadcast %14 : f32 to vector<17x17xf32>
    %184 = arith.mulf %183, %127 : vector<17x17xf32>
    %185 = vector.broadcast %15 : f32 to vector<17x17xf32>
    %186 = arith.mulf %185, %128 : vector<17x17xf32>
    %187 = arith.addf %184, %186 : vector<17x17xf32>
    %188 = vector.broadcast %16 : f32 to vector<17x17xf32>
    %189 = arith.mulf %188, %129 : vector<17x17xf32>
    %190 = arith.addf %187, %189 : vector<17x17xf32>
    %191 = vector.broadcast %17 : f32 to vector<17x17xf32>
    %192 = arith.mulf %191, %130 : vector<17x17xf32>
    %193 = arith.addf %190, %192 : vector<17x17xf32>
    %194 = vector.broadcast %21 : f32 to vector<17x17xf32>
    %195 = arith.addf %193, %194 : vector<17x17xf32>
    %cst_53 = arith.constant 0.000000e+00 : f32
    %196 = vector.broadcast %cst_53 : f32 to vector<17x17xf32>
    %197 = arith.maximumf %195, %196 : vector<17x17xf32>
    %198 = arith.mulf %197, %30 : vector<17x17xf32>
    %199 = arith.addf %182, %198 : vector<17x17xf32>
    %cst_54 = arith.constant dense<0.000000e+00> : vector<17xf32>
    %200 = vector.multi_reduction <add>, %199, %cst_54 [1] : vector<17x17xf32> to vector<17xf32>
    %201 = vector.shape_cast %200 : vector<17xf32> to vector<17x1xf32>
    %cst_55 = arith.constant dense<0.000000e+00> : vector<1xf32>
    %202 = vector.multi_reduction <add>, %201, %cst_55 [0] : vector<17x1xf32> to vector<1xf32>
    %203 = vector.shape_cast %202 : vector<1xf32> to vector<1x1xf32>
    %204 = vector.broadcast %22 : f32 to vector<1x1xf32>
    %205 = arith.addf %203, %204 : vector<1x1xf32>
    %c1_56 = arith.constant 1 : index
    %c0_57 = arith.constant 0 : index
    %c0_58 = arith.constant 0 : index
    %206 = vector.load %arg5[%c1_56, %c0_57, %c0_58] : memref<2x1x1xf32, #tpu.memory_space<vmem>>, vector<1x1x1xf32>
    %207 = vector.shape_cast %206 : vector<1x1x1xf32> to vector<1x1xf32>
    %208 = vector.shape_cast %205 : vector<1x1xf32> to vector<1x1x1xf32>
    tpu.vector_store %arg5[%c1_56, %c0_57, %c0_58], %208 {strides = array<i32>} : memref<2x1x1xf32, #tpu.memory_space<vmem>>, vector<1x1x1xf32>,
    return
  }
}

</mosaic_0001>

<bundles_post_ra>
// kernel: critic_conv_forward.1
= control target key start
LH: loop header
LB: loop body
LE: loop exit
PB: predicated region body
PF: predicated region fallthrough
CT: control target
= control target key end

     0   :  { %11 = vsyncpa [#allocation5], 0  ;;  %s2187_s0 = inlined_call_operand.vmem [shape: f32[16], index: 0, kind: input, shape index: {}]   ;;  %s2188_s1 = inlined_call_operand.vmem [shape: f32[4], index: 1, kind: input, shape index: {}]   ;;  %s2189_s2 = inlined_call_operand.<no memory space> [shape: f32[1], index: 2, kind: input, shape index: {}]   ;;  %s2190_s3 = inlined_call_operand.vmem [shape: f32[2,1,16,16], index: 3, kind: input, shape index: {}]   ;;  %s2191_s4 = inlined_call_operand.vmem [shape: f32[4,17,17], index: 4, kind: input, shape index: {}]   ;;  %s2192_s5 = inlined_call_operand.vmem [shape: f32[2,1,1], index: 5, kind: output, shape index: {}]  }
   0x1   :  { %s18_s20 = sshll.u32 %s2187_s0, 4  ;;  %s19_s20 = int_to_ptr.vmem [resolvable:$true] %s18_s20 }
   0x2   :  { %12 = vsyncpa [#allocation7], 0  ;;  %s27_s23 = sshll.u32 %s2188_s1, 4  ;;  %s1289_s24 = smov [#allocation4]   ;;  %s28_s23 = int_to_ptr.vmem [resolvable:$true] %s27_s23 }
   0x3   :  { %21 = dma.vmem_to_smem %s19_s20, 16, %s1289_s24, [#allocation5]  }
   0x4   :  { %s1290_s25 = smov [#allocation6]  }
   0x5   :  { %30 = dma.vmem_to_smem %s28_s23, 16, %s1290_s25, [#allocation7]  }
   0x6   :  { %1285 = dma.done.wait [#allocation5], 16  }
   0x7   :  { %1286 = vsyncadd [#allocation5], 4294967280 }
   0x8   :  { %1287 = dma.done.wait [#allocation7], 16  }
   0x9   :  { %1288 = vsyncadd [#allocation7], 4294967280 }
   0xa   :  { %45 = sfence }
   0xb   :  { %s1225_s26 = sld [smem:[#allocation4 + $0x1]]  ;;  %v1291_v0 = vmov 0.0   ;;  %s1292_s0 = smov 127   ;;  %v99_v3 = vld [vmem:[%s2190_s3 + $0x8] sm:$0xff]  ;;  %vm100_vm0 = vcmask 130048   ;;  %v98_v4 = vld [vmem:[%s2190_s3] sm:$0xff] }
   0xc   :  { %47 = vst [vmem:[#allocation2 + $0x8] sm:$0xff] %v1291_v0  ;;  %s1227_s28 = sld [smem:[#allocation4 + $0x3]]  ;;  %vm153_vm1 = vcmask 1046528   ;;  %v83_v15 = vld [vmem:[%s2191_s4] sm:$0xff]  ;;  %v84_v19 = vld [vmem:[%s2191_s4 + $0x8] sm:$0xff]  ;;  %v1243_v36 = vld [vmem:[%s2191_s4 + $0x18] sm:$0xff] }
   0xd   :  { %49 = vst [vmem:[#allocation2 + $0x18] sm:$0xff] %v1291_v0  ;;  %s1229_s8 = sld [smem:[#allocation4 + $0x5]]  ;;  %v219_v18 = vrot.slane %v83_v15, 1  ;;  %v220_v21 = vrot.slane %v84_v19, 1  ;;  %v85_v22 = vld [vmem:[%s2191_s4 + $0x10] sm:$0x1] }
   0xe   :  { %51 = vst [vmem:[#allocation2 + $0x28] sm:$0xff] %v1291_v0  ;;  %s1231_s11 = sld [smem:[#allocation4 + $0x7]]  ;;  %v222_v25 = vrot.slane %v85_v22, 1  ;;  %v352_v39 = vrot.slane %v1243_v36, 1  ;;  %v1244_v40 = vld [vmem:[%s2191_s4 + $0x20] sm:$0xff]  ;;  %v1252_v57 = vld [vmem:[%s2190_s3 + $0x10] sm:$0xff] }
   0xf   :  { %57 = vst [vmem:[#allocation2 + $0x58] sm:$0xff] %v1291_v0  ;;  %v221_v24 = vsel %vm153_vm1, %v219_v18, %v220_v21  ;;  %s1233_s16 = sld [smem:[#allocation4 + $0x9]]  ;;  %v353_v42 = vrot.slane %v1244_v40, 1  ;;  %v1245_v43 = vld [vmem:[%s2191_s4 + $0x28] sm:$0x1]  ;;  %v1246_v58 = vld [vmem:[%s2191_s4 + $0x30] sm:$0xff] }
  0x10   :  { %59 = vst [vmem:[#allocation2 + $0x68] sm:$0xff] %v1291_v0  ;;  %v223_v28 = vsel %vm153_vm1, %v220_v21, %v222_v25  ;;  %s1235_s19 = sld [smem:[#allocation4 + $0xb]]  ;;  %v355_v46 = vrot.slane %v1245_v43, 1  ;;  %v1253_v59 = vld [vmem:[%s2190_s3 + $0x18] sm:$0xff]  ;;  %v485_v62 = vrot.slane %v1246_v58, 1  ;;  %s1293_s23 = smov 1  }
  0x11   :  { %v1330_v1 = vstv %s1225_s26  ;;  %102 = vst.msk [vmem:[#allocation2 + $0x28] sm:$0xff] %vm100_vm0, %v99_v3  ;;  %v354_v45 = vsel %vm153_vm1, %v352_v39, %v353_v42  ;;  %s1237_s26 = sld [smem:[#allocation4 + $0xd]]  ;;  %v1247_v63 = vld [vmem:[%s2191_s4 + $0x38] sm:$0xff]  ;;  %vm662_vm2 = vcmask 7168   ;;  %vm669_vm3 = vcmask 138247  }
  0x12   :  { %v1333_v2 = vmul.f32 0.0, %v1330_v1  ;;  %101 = vst.msk [vmem:[#allocation2 + $0x18] sm:$0xff] %vm100_vm0, %v98_v4  ;;  %v1345_v5 = vstv %s1227_s28  ;;  %v356_v49 = vsel %vm153_vm1, %v353_v42, %v355_v46  ;;  %s1239_s30 = sld [smem:[#allocation4 + $0xf]]  ;;  %v486_v3 = vrot.slane %v1247_v63, 1  ;;  %v1248_v4 = vld [vmem:[%s2191_s4 + $0x40] sm:$0x1] }
  0x13   :  { %v1362_v14 = vmul.f32 0.0, %v1345_v5  ;;  %v1381_v23 = vstv %s1229_s8  ;;  %709 = vst.msk [vmem:[#allocation2 + $0x58] sm:$0xff] %vm100_vm0, %v1252_v57  ;;  %s1226_s9 = sld [smem:[#allocation4 + $0x2]]  ;;  %vm673_vm4 = vcmask 138240   ;;  %vm683_vm5 = vcmask 1040384  }
  0x14   :  { %125 = vrot.lane.b32.xlu0 %v1333_v2, %s1292_s0  ;;  %v1386_v26 = vmul.f32 0.0, %v1381_v23  ;;  %v1388_v27 = vstv %s1231_s11  ;;  %710 = vst.msk [vmem:[#allocation2 + $0x68] sm:$0xff] %vm100_vm0, %v1253_v59  ;;  %s1230_s10 = sld [smem:[#allocation4 + $0x6]]  ;;  %vm703_vm6 = vcmask 0  }
  0x15   :  { %v186_v17 = vrot.slane %v1362_v14, 1  ;;  %v1406_v35 = vmul.f32 0.0, %v1388_v27  ;;  %v1425_v44 = vstv %s1233_s16  ;;  %s62_s11 = sld [smem:[#allocation4]] }
  0x16   :  { %v1430_v47 = vmul.f32 0.0, %v1425_v44  ;;  %v1432_v48 = vstv %s1235_s19  ;;  %s1228_s12 = sld [smem:[#allocation4 + $0x4]] }
  0x17   :  { %v319_v38 = vrot.slane %v1406_v35, 1  ;;  %v1450_v56 = vmul.f32 0.0, %v1432_v48  ;;  %s78_s13 = sld [smem:[#allocation6]] }
  0x18   :  { %v1347_v6 = vld [vmem:[#allocation2 + $0x28] sm:$0xff]  ;;  %s1240_s14 = sld [smem:[#allocation6 + $0x1]] }
  0x19   :  { %v121_v7 = vmul.f32 %v1330_v1, %v1347_v6  ;;  %v1351_v8 = vld [vmem:[#allocation2 + $0x18] sm:$0xff]  ;;  %v178_v9 = vmul.f32 %v1345_v5, %v1347_v6  ;;  %v311_v32 = vmul.f32 %v1388_v27, %v1347_v6  ;;  %v255_v33 = vmul.f32 %v1381_v23, %v1347_v6  ;;  %s1234_s15 = sld [smem:[#allocation4 + $0xa]] }
  0x1a   :  { %v177_v10 = vmul.f32 %v1345_v5, %v1351_v8  ;;  %v120_v11 = vmul.f32 %v1330_v1, %v1351_v8  ;;  %v310_v29 = vmul.f32 %v1388_v27, %v1351_v8  ;;  %v254_v30 = vmul.f32 %v1381_v23, %v1351_v8  ;;  %s1232_s16 = sld [smem:[#allocation4 + $0x8]] }
  0x1b   :  { %129 = vrot.lane.b32.xlu1 %v121_v7, %s1292_s0  ;;  %v184_v12 = vrot.slane %v178_v9, 1  ;;  %v317_v34 = vrot.slane %v311_v32, 1  ;;  %v443_v50 = vmul.f32 %v1432_v48, %v1351_v8  ;;  %v387_v51 = vmul.f32 %v1425_v44, %v1351_v8  ;;  %v1523_v32 = vld [vmem:[#allocation2 + $0x58] sm:$0xff]  ;;  %s1241_s17 = sld [smem:[#allocation6 + $0x2]] }
  0x1c   :  { %v183_v13 = vrot.slane %v177_v10, 1  ;;  %127 = vrot.lane.b32.xlu0 %v120_v11, %s1292_s0  ;;  %v316_v31 = vrot.slane %v310_v29, 1  ;;  %v444_v53 = vmul.f32 %v1432_v48, %v1347_v6  ;;  %v388_v54 = vmul.f32 %v1425_v44, %v1347_v6  ;;  %s1238_s22 = sld [smem:[#allocation4 + $0xe]] }
  0x1d   :  { %v187_v20 = vsel %vm153_vm1, %v184_v12, %v186_v17  ;;  %v320_v41 = vsel %vm153_vm1, %v317_v34, %v319_v38  ;;  %v449_v52 = vrot.slane %v443_v50, 1  ;;  %v452_v61 = vrot.slane %v1450_v56, 1 }
  0x1e   :  { %v185_v16 = vsel %vm153_vm1, %v183_v13, %v184_v12  ;;  %v318_v37 = vsel %vm153_vm1, %v316_v31, %v317_v34  ;;  %v450_v55 = vrot.slane %v444_v53, 1  ;;  %v1477_v7 = vstv %s1237_s26 }
  0x1f   :  { %190 = vrot.lane.b32.xlu2 %v185_v16, %s1292_s0  ;;  %v487_v9 = vsel %vm153_vm1, %v485_v62, %v486_v3  ;;  %v488_v10 = vrot.slane %v1248_v4, 1  ;;  %v1482_v11 = vmul.f32 0.0, %v1477_v7  ;;  %v1484_v12 = vstv %s1239_s30 }
  0x20   :  { %v451_v60 = vsel %vm153_vm1, %v449_v52, %v450_v55  ;;  %v453_v0 = vsel %vm153_vm1, %v450_v55, %v452_v61  ;;  %v576_v15 = vmul.f32 %v1484_v12, %v1351_v8  ;;  %v520_v16 = vmul.f32 %v1477_v7, %v1351_v8 }
  0x21   :  { %v577_v19 = vmul.f32 %v1484_v12, %v1347_v6  ;;  %v1502_v22 = vmul.f32 0.0, %v1484_v12  ;;  %v726_v34 = vmul.f32 %v1523_v32, %v1330_v1  ;;  %v1545_v40 = vstv %s1226_s9 }
  0x22   :  { %v144_v43 = vmul.f32 %v1545_v40, %v1347_v6  ;;  %v1563_v46 = vmul.f32 %v1545_v40, %v1351_v8  ;;  %v1589_v14 = vstv %s1228_s12  ;;  %v1113_v56 = vmul.f32 %v1523_v32, %v1484_v12 }
  0x23   :  { %188 = vrot.lane.b32.xlu1 %v183_v13, %s1292_s0  ;;  %v489_v13 = vsel %vm153_vm1, %v486_v3, %v488_v10  ;;  %v583_v21 = vrot.slane %v577_v19, 1 }
  0x24   :  { %224 = vrot.lane.b32.xlu0 %v219_v18, %s1292_s0  ;;  %v582_v18 = vrot.slane %v576_v15, 1  ;;  %v158_v50 = vrot.slane %v144_v43, 1 }
  0x26   :  { %v584_v25 = vsel %vm153_vm1, %v582_v18, %v583_v21 }
  0x27   :  { %192 = vrot.lane.b32.xlu2 %v187_v20, %s1292_s0  ;;  %v521_v20 = vmul.f32 %v1477_v7, %v1347_v6 }
  0x2b   :  { %226 = vrot.lane.b32.xlu1 %v221_v24, %s1292_s0  ;;  %v1507_v24 = vld [vmem:[%s2191_s4 + $0x48] sm:$0xff] }
  0x2c   :  { %259 = vrot.lane.b32.xlu0 %v1386_v26, %s1292_s0  ;;  %v618_v29 = vrot.slane %v1507_v24, 1 }
  0x2f   :  { %228 = vrot.lane.b32.xlu2 %v223_v28, %s1292_s0  ;;  %v585_v28 = vrot.slane %v1502_v22, 1  ;;  %v1251_v22 = vld [vmem:[%s2191_s4 + $0x58] sm:$0x1] }
  0x33   :  { %261 = vrot.lane.b32.xlu1 %v254_v30, %s1292_s0  ;;  %v586_v30 = vsel %vm153_vm1, %v583_v21, %v585_v28 }
  0x34   :  { %321 = vrot.lane.b32.xlu0 %v316_v31, %s1292_s0  ;;  %v1520_v31 = vld [vmem:[#allocation2 + $0x68] sm:$0xff] }
  0x35   :  { %v838_v36 = vmul.f32 %v1520_v31, %v1381_v23 }
  0x37   :  { %263 = vrot.lane.b32.xlu2 %v255_v33, %s1292_s0  ;;  %v727_v33 = vmul.f32 %v1520_v31, %v1330_v1  ;;  %v949_v1 = vmul.f32 %v1520_v31, %v1425_v44 }
  0x3b   :  { %323 = vrot.lane.b32.xlu1 %v318_v37, %s1292_s0 }
  0x3c   :  { %357 = vrot.lane.b32.xlu0 %v352_v39, %s1292_s0  ;;  %v837_v39 = vmul.f32 %v1523_v32, %v1381_v23  ;;  %v948_v23 = vmul.f32 %v1523_v32, %v1425_v44  ;;  %v1568_v44 = vstv %s62_s11 }
  0x3d   :  { %v1584_v58 = vmul.f32 0.0, %v1568_v44  ;;  %v117_v59 = vmul.f32 %v1568_v44, %v1347_v6 }
  0x3f   :  { %325 = vrot.lane.b32.xlu2 %v320_v41, %s1292_s0  ;;  %v781_v41 = vmul.f32 %v1520_v31, %v1345_v5 }
  0x43   :  { %359 = vrot.lane.b32.xlu1 %v354_v45, %s1292_s0  ;;  %v145_v45 = vmul.f32 0.0, %v1545_v40 }
  0x44   :  { %392 = vrot.lane.b32.xlu0 %v1430_v47, %s1292_s0 }
  0x47   :  { %361 = vrot.lane.b32.xlu2 %v356_v49, %s1292_s0  ;;  %v1565_v49 = vstv %s1230_s10 }
  0x48   :  { %v277_v55 = vmul.f32 0.0, %v1565_v49  ;;  %v1581_v57 = vmul.f32 %v1565_v49, %v1347_v6 }
  0x4a   :  { %v291_v10 = vrot.slane %v1581_v57, 1  ;;  %v1119_v57 = vrot.slane %v1113_v56, 1 }
  0x4b   :  { %394 = vrot.lane.b32.xlu1 %v387_v51, %s1292_s0  ;;  %v1570_v51 = vrot.slane %v145_v45, 1 }
  0x4c   :  { %454 = vrot.lane.b32.xlu0 %v449_v52, %s1292_s0 }
  0x4d   :  { %v163_v63 = vsel %vm153_vm1, %v158_v50, %v1570_v51 }
  0x4f   :  { %396 = vrot.lane.b32.xlu2 %v388_v54, %s1292_s0  ;;  %v155_v54 = vrot.slane %v1563_v46, 1 }
  0x51   :  { %v159_v4 = vsel %vm153_vm1, %v155_v54, %v158_v50 }
  0x53   :  { %456 = vrot.lane.b32.xlu1 %v451_v60, %s1292_s0  ;;  %v115_v60 = vmul.f32 %v1568_v44, %v1351_v8 }
  0x54   :  { %490 = vrot.lane.b32.xlu0 %v485_v62, %s1292_s0  ;;  %v892_v62 = vmul.f32 %v1520_v31, %v1388_v27 }
  0x57   :  { %458 = vrot.lane.b32.xlu2 %v453_v0, %s1292_s0 }
  0x5b   :  { %492 = vrot.lane.b32.xlu1 %v487_v9, %s1292_s0  ;;  %v1604_v9 = vrot.slane %v277_v55, 1  ;;  %v1639_v55 = vstv %s78_s13 }
  0x5c   :  { %525 = vrot.lane.b32.xlu0 %v1482_v11, %s1292_s0 }
  0x5f   :  { %494 = vrot.lane.b32.xlu2 %v489_v13, %s1292_s0 }
  0x63   :  { %527 = vrot.lane.b32.xlu1 %v520_v16, %s1292_s0  ;;  %v251_v16 = vmul.f32 %v1589_v14, %v1347_v6 }
  0x64   :  { %587 = vrot.lane.b32.xlu0 %v582_v18, %s1292_s0 }
  0x67   :  { %529 = vrot.lane.b32.xlu2 %v521_v20, %s1292_s0 }
  0x6b   :  { %589 = vrot.lane.b32.xlu1 %v584_v25, %s1292_s0  ;;  %v898_v25 = vrot.slane %v892_v62, 1 }
  0x6c   :  { %623 = vrot.lane.b32.xlu0 %v618_v29, %s1292_s0 }
  0x6f   :  { %591 = vrot.lane.b32.xlu2 %v586_v30, %s1292_s0 }
  0x73   :  { %731 = vrot.lane.b32.xlu1 %v1333_v2, %s1292_s0 }
  0x74   :  { %735 = vrot.lane.b32.xlu0 %v727_v33, %s1292_s0 }
  0x77   :  { %733 = vrot.lane.b32.xlu2 %v726_v34, %s1292_s0 }
  0x79   :  { %v1535_v37 = vpop.permute.xlu2 %190 }
  0x7b   :  { %842 = vrot.lane.b32.xlu1 %v1386_v26, %s1292_s0  ;;  %v780_v26 = vmul.f32 %v1523_v32, %v1345_v5 }
  0x7c   :  { %846 = vrot.lane.b32.xlu0 %v838_v36, %s1292_s0 }
  0x7d   :  { %v786_v5 = vrot.slane %v780_v26, 1 }
  0x7f   :  { %844 = vrot.lane.b32.xlu2 %v837_v39, %s1292_s0 }
  0x81   :  { %v193_v2 = vpop.permute.xlu2 %192 }
  0x83   :  { %953 = vrot.lane.b32.xlu1 %v1430_v47, %s1292_s0  ;;  %v787_v47 = vrot.slane %v781_v41, 1  ;;  %v901_v41 = vsel %vm153_vm1, %v898_v25, %v319_v38 }
  0x84   :  { %957 = vrot.lane.b32.xlu0 %v949_v1, %s1292_s0  ;;  %v296_v1 = vsel %vm153_vm1, %v291_v10, %v1604_v9 }
  0x85   :  { %v790_v52 = vsel %vm153_vm1, %v787_v47, %v186_v17  ;;  %v891_v17 = vmul.f32 %v1523_v32, %v1388_v27  ;;  %v788_v0 = vsel %vm153_vm1, %v786_v5, %v787_v47  ;;  %v1609_v27 = vmul.f32 0.0, %v1589_v14 }
  0x86   :  { %v1556_v42 = vpop.permute.xlu0 %125 }
  0x87   :  { %955 = vrot.lane.b32.xlu2 %v948_v23, %s1292_s0  ;;  %v897_v19 = vrot.slane %v891_v17, 1 }
  0x89   :  { %v1575_v53 = vpop.permute.xlu2 %228  ;;  %v899_v50 = vsel %vm153_vm1, %v897_v19, %v898_v25 }
  0x8a   :  { %2203 = vst [vmem:[#allocation10_spill] sm:$0xff] %v1575_v53 }
  0x8b   :  { %791 = vrot.lane.b32.xlu1 %v786_v5, %s1292_s0 }
  0x8c   :  { %795 = vrot.lane.b32.xlu0 %v790_v52, %s1292_s0 }
  0x8d   :  { %v130_v3 = vpop.permute.xlu1 %129 }
  0x8e   :  { %v138_v13 = vadd.f32 %v130_v3, %v1584_v58  ;;  %v139_v15 = vadd.f32 %v130_v3, %v117_v59  ;;  %v128_v18 = vpop.permute.xlu0 %127  ;;  %v1644_v59 = vstv %s1240_s14  ;;  %v1059_v3 = vmul.f32 %v1523_v32, %v1477_v7 }
  0x8f   :  { %793 = vrot.lane.b32.xlu2 %v788_v0, %s1292_s0  ;;  %v136_v20 = vadd.f32 %v128_v18, %v1584_v58  ;;  %v137_v21 = vadd.f32 %v128_v18, %v115_v60  ;;  %v1661_v18 = vmul.f32 %v1565_v49, %v1351_v8 }
  0x90   :  { %v174_v30 = vadd.f32 %v1570_v51, %v138_v13  ;;  %v175_v33 = vadd.f32 %v163_v63, %v139_v15  ;;  %v1003_v13 = vmul.f32 %v1520_v31, %v1432_v48 }
  0x91   :  { %v264_v34 = vpop.permute.xlu2 %263  ;;  %v172_v36 = vadd.f32 %v1570_v51, %v136_v20  ;;  %v173_v39 = vadd.f32 %v159_v4, %v137_v21  ;;  %v1002_v4 = vmul.f32 %v1523_v32, %v1432_v48 }
  0x92   :  { %v201_v23 = vadd.f32 %v193_v2, %v174_v30  ;;  %v202_v26 = vadd.f32 %v193_v2, %v175_v33  ;;  %v272_v43 = vadd.f32 %v264_v34, %v1609_v27  ;;  %v273_v45 = vadd.f32 %v264_v34, %v251_v16 }
  0x93   :  { %902 = vrot.lane.b32.xlu1 %v897_v19, %s1292_s0  ;;  %v1627_v47 = vadd.f32 %v1535_v37, %v172_v36  ;;  %v1630_v5 = vadd.f32 %v1535_v37, %v173_v39  ;;  %v1060_v37 = vmul.f32 %v1520_v31, %v1477_v7  ;;  %v1665_v7 = vstv %s1234_s15 }
  0x94   :  { %v308_v52 = vadd.f32 %v296_v1, %v273_v45  ;;  %906 = vrot.lane.b32.xlu0 %v901_v41, %s1292_s0  ;;  %v307_v38 = vadd.f32 %v1604_v9, %v272_v43  ;;  %v208_v60 = vadd.f32 %v1639_v55, %v201_v23  ;;  %v209_v62 = vadd.f32 %v1639_v55, %v202_v26 }
  0x95   :  { %v1634_v35 = vpop.permute.xlu1 %188  ;;  %v1008_v30 = vrot.slane %v1002_v4, 1  ;;  %v1009_v33 = vrot.slane %v1003_v13, 1  ;;  %v249_v34 = vmul.f32 %v1589_v14, %v1351_v8  ;;  %v288_v36 = vrot.slane %v1661_v18, 1 }
  0x96   :  { %v1637_v2 = vpop.permute.xlu0 %224  ;;  %v214_v19 = vmax.f32 %v208_v60, 0.0  ;;  %v215_v20 = vmax.f32 %v209_v62, 0.0  ;;  %v410_v41 = vmul.f32 0.0, %v1665_v7  ;;  %v1681_v23 = vmul.f32 %v1665_v7, %v1347_v6 }
  0x97   :  { %904 = vrot.lane.b32.xlu2 %v899_v50, %s1292_s0  ;;  %v1012_v1 = vsel %vm153_vm1, %v1009_v33, %v452_v61  ;;  %v1114_v61 = vmul.f32 %v1520_v31, %v1484_v12  ;;  %v292_v62 = vsel %vm153_vm1, %v288_v36, %v291_v10 }
  0x98   :  { %v237_v26 = vmul.f32 %v1575_v53, %v214_v19  ;;  %v238_v43 = vmul.f32 %v1575_v53, %v215_v20 }
  0x99   :  { %v326_v17 = vpop.permute.xlu2 %325 }
  0x9a   :  { %v334_v63 = vadd.f32 %v326_v17, %v307_v38  ;;  %v335_v0 = vadd.f32 %v326_v17, %v308_v52  ;;  %v1688_v52 = vstv %s1232_s16  ;;  %v1010_v17 = vsel %vm153_vm1, %v1008_v30, %v1009_v33 }
  0x9b   :  { %1064 = vrot.lane.b32.xlu1 %v1482_v11, %s1292_s0  ;;  %v1710_v4 = vmul.f32 0.0, %v1688_v52  ;;  %v384_v13 = vmul.f32 %v1688_v52, %v1347_v6 }
  0x9c   :  { %v341_v15 = vadd.f32 %v1644_v59, %v334_v63  ;;  %v342_v16 = vadd.f32 %v1644_v59, %v335_v0  ;;  %1068 = vrot.lane.b32.xlu0 %v1060_v37, %s1292_s0  ;;  %v1705_v63 = vrot.slane %v410_v41, 1  ;;  %v424_v0 = vrot.slane %v1681_v23, 1 }
  0x9d   :  { %v1663_v11 = vpop.permute.xlu1 %226 }
  0x9e   :  { %v347_v21 = vmax.f32 %v341_v15, 0.0  ;;  %v348_v25 = vmax.f32 %v342_v16, 0.0  ;;  %v1667_v48 = vpop.permute.xlu0 %259  ;;  %v1120_v16 = vrot.slane %v1114_v61, 1  ;;  %v429_v20 = vsel %vm153_vm1, %v424_v0, %v1705_v63 }
  0x9f   :  { %1066 = vrot.lane.b32.xlu2 %v1059_v3, %s1292_s0 }
  0xa1   :  { %v1673_v39 = vpop.permute.xlu2 %361 }
  0xa2   :  { %v370_v45 = vmul.f32 %v1673_v39, %v347_v21  ;;  %v371_v50 = vmul.f32 %v1673_v39, %v348_v25  ;;  %v1123_v21 = vsel %vm153_vm1, %v1120_v16, %v585_v28  ;;  %v1250_v25 = vld [vmem:[%s2191_s4 + $0x50] sm:$0xff]  ;;  %v206_v28 = vadd.f32 %v1639_v55, %v1627_v47  ;;  %s1236_s4 = sld [smem:[#allocation4 + $0xc]] }
  0xa3   :  { %1013 = vrot.lane.b32.xlu1 %v1008_v30, %s1292_s0 }
  0xa4   :  { %v1694_v38 = vadd.f32 %v370_v45, %v237_v26  ;;  %v1696_v37 = vadd.f32 %v371_v50, %v238_v43  ;;  %1017 = vrot.lane.b32.xlu0 %v1012_v1, %s1292_s0  ;;  %v1121_v1 = vsel %vm153_vm1, %v1119_v57, %v1120_v16  ;;  %v619_v26 = vrot.slane %v1250_v25, 1 }
  0xa5   :  { %v262_v60 = vpop.permute.xlu1 %261  ;;  %v207_v43 = vadd.f32 %v1639_v55, %v1630_v5  ;;  %v212_v5 = vmax.f32 %v206_v28, 0.0 }
  0xa6   :  { %v270_v12 = vadd.f32 %v262_v60, %v1609_v27  ;;  %v271_v3 = vadd.f32 %v262_v60, %v249_v34  ;;  %v1714_v15 = vpop.permute.xlu0 %321  ;;  %v621_v60 = vrot.slane %v1251_v22, 1  ;;  %v620_v47 = vsel %vm153_vm1, %v618_v29, %v619_v26 }
  0xa7   :  { %1015 = vrot.lane.b32.xlu2 %v1010_v17, %s1292_s0  ;;  %v235_v29 = vmul.f32 %v1663_v11, %v212_v5  ;;  %v382_v5 = vmul.f32 %v1688_v52, %v1351_v8 }
  0xa8   :  { %v306_v10 = vadd.f32 %v292_v62, %v271_v3  ;;  %v305_v34 = vadd.f32 %v1604_v9, %v270_v12  ;;  %v213_v3 = vmax.f32 %v207_v43, 0.0 }
  0xa9   :  { %v397_v19 = vpop.permute.xlu2 %396 }
  0xaa   :  { %v405_v30 = vadd.f32 %v397_v19, %v1710_v4  ;;  %v406_v33 = vadd.f32 %v397_v19, %v384_v13  ;;  %v1748_v13 = vstv %s1241_s17  ;;  %v622_v19 = vsel %vm153_vm1, %v619_v26, %v621_v60 }
  0xab   :  { %1124 = vrot.lane.b32.xlu1 %v1119_v57, %s1292_s0 }
  0xac   :  { %v441_v41 = vadd.f32 %v429_v20, %v406_v33  ;;  %1128 = vrot.lane.b32.xlu0 %v1123_v21, %s1292_s0  ;;  %v440_v61 = vadd.f32 %v1705_v63, %v405_v30  ;;  %v236_v30 = vmul.f32 %v1663_v11, %v213_v3  ;;  %v1780_v3 = vstv %s1236_s4 }
  0xad   :  { %v324_v45 = vpop.permute.xlu1 %323 }
  0xae   :  { %v332_v50 = vadd.f32 %v324_v45, %v305_v34  ;;  %v333_v56 = vadd.f32 %v324_v45, %v306_v10  ;;  %v1740_v17 = vpop.permute.xlu0 %357  ;;  %v409_v34 = vmul.f32 %v1665_v7, %v1351_v8 }
  0xaf   :  { %1126 = vrot.lane.b32.xlu2 %v1121_v1, %s1292_s0  ;;  %v1760_v1 = vstv %s1238_s22 }
  0xb0   :  { %v339_v62 = vadd.f32 %v1644_v59, %v332_v50  ;;  %v340_v12 = vadd.f32 %v1644_v59, %v333_v56  ;;  %v543_v60 = vmul.f32 0.0, %v1760_v1 }
  0xb1   :  { %v459_v57 = vpop.permute.xlu2 %458 }
  0xb2   :  { %v467_v16 = vadd.f32 %v459_v57, %v440_v61  ;;  %v468_v10 = vadd.f32 %v459_v57, %v441_v41  ;;  %v345_v20 = vmax.f32 %v339_v62, 0.0  ;;  %v346_v21 = vmax.f32 %v340_v12, 0.0 }
  0xb3   :  { %625 = vrot.lane.b32.xlu1 %v620_v47, %s1292_s0  ;;  %v421_v61 = vrot.slane %v409_v34, 1  ;;  %v1774_v62 = vmul.f32 %v1760_v1, %v1347_v6 }
  0xb4   :  { %v474_v25 = vadd.f32 %v1748_v13, %v467_v16  ;;  %v475_v24 = vadd.f32 %v1748_v13, %v468_v10 }
  0xb5   :  { %v1756_v33 = vpop.permute.xlu1 %359 }
  0xb6   :  { %v480_v41 = vmax.f32 %v474_v25, 0.0  ;;  %v481_v26 = vmax.f32 %v475_v24, 0.0  ;;  %v368_v22 = vmul.f32 %v1756_v33, %v345_v20  ;;  %v369_v28 = vmul.f32 %v1756_v33, %v346_v21  ;;  %v393_v43 = vpop.permute.xlu0 %392 }
  0xb7   :  { %627 = vrot.lane.b32.xlu2 %v622_v19, %s1292_s0  ;;  %v425_v19 = vsel %vm153_vm1, %v421_v61, %v424_v0  ;;  %v1791_v20 = vrot.slane %v543_v60, 1  ;;  %v557_v21 = vrot.slane %v1774_v62, 1  ;;  %s1242_s0 = sld [smem:[#allocation6 + $0x3]] }
  0xb8   :  { %v1765_v45 = vadd.f32 %v368_v22, %v235_v29  ;;  %v1767_v50 = vadd.f32 %v369_v28, %v236_v30  ;;  %v1796_v29 = vmul.f32 0.0, %v1780_v3 }
  0xb9   :  { %v1769_v56 = vpop.permute.xlu2 %494  ;;  %v562_v23 = vsel %vm153_vm1, %v557_v21, %v1791_v20 }
  0xba   :  { %2204 = vst [vmem:[#allocation11_spill] sm:$0xff] %v1769_v56  ;;  %v503_v12 = vmul.f32 %v1769_v56, %v480_v41  ;;  %v504_v47 = vmul.f32 %v1769_v56, %v481_v26  ;;  %v268_v26 = vadd.f32 %v1667_v48, %v1609_v27 }
  0xbc   :  { %v1783_v57 = vadd.f32 %v503_v12, %v1694_v38  ;;  %v1786_v16 = vadd.f32 %v504_v47, %v1696_v37  ;;  %v517_v38 = vmul.f32 %v1780_v3, %v1347_v6  ;;  %v134_v6 = vadd.f32 %v1556_v42, %v1584_v58 }
  0xbd   :  { %v395_v10 = vpop.permute.xlu1 %394 }
  0xbe   :  { %v403_v25 = vadd.f32 %v395_v10, %v1710_v4  ;;  %v404_v24 = vadd.f32 %v395_v10, %v382_v5  ;;  %v455_v37 = vpop.permute.xlu0 %454  ;;  %v170_v42 = vadd.f32 %v1570_v51, %v134_v6 }
  0xc0   :  { %v439_v30 = vadd.f32 %v425_v19, %v404_v24  ;;  %v438_v22 = vadd.f32 %v1705_v63, %v403_v25  ;;  %v401_v19 = vadd.f32 %v393_v43, %v1710_v4  ;;  %v303_v24 = vadd.f32 %v1604_v9, %v268_v26 }
  0xc1   :  { %v530_v34 = vpop.permute.xlu2 %529  ;;  %v304_v25 = vadd.f32 %v288_v36, %v268_v26  ;;  %v542_v26 = vmul.f32 %v1760_v1, %v1351_v8  ;;  %v197_v46 = vadd.f32 %v1634_v35, %v170_v42 }
  0xc2   :  { %v538_v0 = vadd.f32 %v530_v34, %v1796_v29  ;;  %v539_v41 = vadd.f32 %v530_v34, %v517_v38  ;;  %v437_v4 = vadd.f32 %v421_v61, %v401_v19  ;;  %v436_v43 = vadd.f32 %v1705_v63, %v401_v19 }
  0xc3   :  { %v331_v18 = vadd.f32 %v1714_v15, %v304_v25 }
  0xc4   :  { %v574_v28 = vadd.f32 %v562_v23, %v539_v41  ;;  %v573_v5 = vadd.f32 %v1791_v20, %v538_v0  ;;  %v330_v41 = vadd.f32 %v1714_v15, %v303_v24 }
  0xc5   :  { %v457_v60 = vpop.permute.xlu1 %456 }
  0xc6   :  { %v465_v12 = vadd.f32 %v457_v60, %v438_v22  ;;  %v466_v47 = vadd.f32 %v457_v60, %v439_v30  ;;  %v1811_v10 = vpop.permute.xlu0 %490  ;;  %v171_v30 = vadd.f32 %v155_v54, %v134_v6  ;;  %v463_v6 = vadd.f32 %v455_v37, %v436_v43 }
  0xc7   :  { %v337_v15 = vadd.f32 %v1644_v59, %v330_v41 }
  0xc8   :  { %v472_v38 = vadd.f32 %v1748_v13, %v465_v12  ;;  %v473_v48 = vadd.f32 %v1748_v13, %v466_v47  ;;  %v198_v54 = vadd.f32 %v1634_v35, %v171_v30  ;;  %v464_v12 = vadd.f32 %v455_v37, %v437_v4 }
  0xc9   :  { %v592_v34 = vpop.permute.xlu2 %591  ;;  %v338_v35 = vadd.f32 %v1644_v59, %v331_v18  ;;  %v515_v37 = vmul.f32 %v1780_v3, %v1351_v8 }
  0xca   :  { %v1822_v23 = vadd.f32 %v592_v34, %v573_v5  ;;  %v1824_v0 = vadd.f32 %v592_v34, %v574_v28  ;;  %v478_v22 = vmax.f32 %v472_v38, 0.0  ;;  %v479_v60 = vmax.f32 %v473_v48, 0.0 }
  0xcb   :  { %v554_v38 = vrot.slane %v542_v26, 1  ;;  %v204_v48 = vadd.f32 %v1639_v55, %v197_v46  ;;  %v205_v25 = vadd.f32 %v1639_v55, %v198_v54  ;;  %v470_v34 = vadd.f32 %v1748_v13, %v463_v6 }
  0xcc   :  { %v471_v42 = vadd.f32 %v1748_v13, %v464_v12  ;;  %v344_v4 = vmax.f32 %v338_v35, 0.0  ;;  %v1858_v6 = vstv %s1242_s0 }
  0xcd   :  { %v1829_v36 = vpop.permute.xlu1 %492  ;;  %v558_v41 = vsel %vm153_vm1, %v554_v38, %v557_v21  ;;  %v476_v46 = vmax.f32 %v470_v34, 0.0 }
  0xce   :  { %v501_v28 = vmul.f32 %v1829_v36, %v478_v22  ;;  %v502_v61 = vmul.f32 %v1829_v36, %v479_v60  ;;  %v526_v63 = vpop.permute.xlu0 %525  ;;  %v210_v22 = vmax.f32 %v204_v48, 0.0  ;;  %v211_v60 = vmax.f32 %v205_v25, 0.0 }
  0xcf   :  { %v534_v47 = vadd.f32 %v526_v63, %v1796_v29  ;;  %v477_v54 = vmax.f32 %v471_v42, 0.0  ;;  %v1871_v48 = vmul.f32 %v1520_v31, %v1545_v40  ;;  %v499_v25 = vmul.f32 %v1811_v10, %v476_v46 }
  0xd0   :  { %v1840_v5 = vadd.f32 %v501_v28, %v1765_v45  ;;  %v1843_v19 = vadd.f32 %v502_v61, %v1767_v50  ;;  %v343_v50 = vmax.f32 %v337_v15, 0.0  ;;  %v234_v35 = vmul.f32 %v1637_v2, %v211_v60 }
  0xd1   :  { %v734_v24 = vpop.permute.xlu2 %733  ;;  %v570_v45 = vadd.f32 %v554_v38, %v534_v47  ;;  %v569_v30 = vadd.f32 %v1791_v20, %v534_v47  ;;  %v367_v47 = vmul.f32 %v1740_v17, %v344_v4  ;;  %v1867_v38 = vmul.f32 %v1523_v32, %v1545_v40 }
  0xd2   :  { %2205 = vst [vmem:[#allocation12_spill] sm:$0xff] %v1840_v5  ;;  %v366_v63 = vmul.f32 %v1740_v17, %v343_v50  ;;  %v722_v4 = vmul.f32 %v1523_v32, %v1568_v44 }
  0xd3   :  { %2206 = vst [vmem:[#allocation13_spill] sm:$0xff] %v1843_v19  ;;  %v373_v50 = vadd.f32 %v367_v47, %v234_v35  ;;  %v2194_v60 = vrot.slane %v1867_v38, 1 }
  0xd4   :  { %v743_v47 = vadd.f32 %v734_v24, %v722_v4 }
  0xd5   :  { %v528_v43 = vpop.permute.xlu1 %527 }
  0xd6   :  { %v536_v18 = vadd.f32 %v528_v43, %v1796_v29  ;;  %v537_v26 = vadd.f32 %v528_v43, %v515_v37  ;;  %v588_v8 = vpop.permute.xlu0 %587  ;;  %v233_v29 = vmul.f32 %v1637_v2, %v210_v22  ;;  %v500_v37 = vmul.f32 %v1811_v10, %v477_v54 }
  0xd7   :  { %v596_v28 = vadd.f32 %v588_v8, %v569_v30  ;;  %v597_v61 = vadd.f32 %v588_v8, %v570_v45 }
  0xd8   :  { %v572_v12 = vadd.f32 %v558_v41, %v537_v26  ;;  %v571_v45 = vadd.f32 %v1791_v20, %v536_v18  ;;  %v372_v30 = vadd.f32 %v366_v63, %v233_v29  ;;  %v2195_v26 = vrot.slane %v1871_v48, 1 }
  0xd9   :  { %v845_v62 = vpop.permute.xlu2 %844  ;;  %v603_v21 = vadd.f32 %v1858_v6, %v596_v28  ;;  %v604_v15 = vadd.f32 %v1858_v6, %v597_v61  ;;  %v506_v18 = vadd.f32 %v500_v37, %v373_v50  ;;  %v742_v63 = vadd.f32 %v734_v24, %v1584_v58 }
  0xda   :  { %v505_v46 = vadd.f32 %v499_v25, %v372_v30  ;;  %v833_v29 = vmul.f32 %v1523_v32, %v1589_v14  ;;  %v853_v30 = vadd.f32 %v845_v62, %v1609_v27 }
  0xdb   :  { %v609_v34 = vmax.f32 %v603_v21, 0.0  ;;  %v610_v42 = vmax.f32 %v604_v15, 0.0  ;;  %v1898_v21 = vmul.f32 %v1523_v32, %v1565_v49  ;;  %v1902_v15 = vmul.f32 %v1520_v31, %v1565_v49 }
  0xdc   :  { %v776_v35 = vadd.f32 %v742_v63, %v1570_v51  ;;  %v854_v50 = vadd.f32 %v845_v62, %v833_v29 }
  0xdd   :  { %v590_v43 = vpop.permute.xlu1 %589 }
  0xde   :  { %v1878_v41 = vadd.f32 %v590_v43, %v571_v45  ;;  %v1880_v22 = vadd.f32 %v590_v43, %v572_v12  ;;  %v1882_v40 = vpop.permute.xlu0 %623  ;;  %v763_v12 = vsel %vm153_vm1, %v2194_v60, %v2195_v26 }
  0xdf   :  { %v632_v8 = vmul.f32 %v1882_v40, %v609_v34  ;;  %v633_v20 = vmul.f32 %v1882_v40, %v610_v42  ;;  %v777_v25 = vadd.f32 %v763_v12, %v743_v47  ;;  %v2196_v34 = vrot.slane %v1898_v21, 1 }
  0xe0   :  { %v2193_v42 = vrot.slane %v1902_v15, 1 }
  0xe1   :  { %v956_v54 = vpop.permute.xlu2 %955  ;;  %v639_v28 = vadd.f32 %v633_v20, %v506_v18  ;;  %v638_v61 = vadd.f32 %v632_v8, %v505_v46  ;;  %v887_v20 = vadd.f32 %v853_v30, %v1604_v9 }
  0xe2   :  { %v874_v43 = vsel %vm153_vm1, %v2196_v34, %v2193_v42  ;;  %v1260_v42 = vld [vmem:[#allocation2 + $0x8] sm:$0xff] }
  0xe3   :  { %652 = vrot.lane.b32.xlu1 %v639_v28, %s1293_s23  ;;  %650 = vrot.lane.b32.xlu0 %v638_v61, %s1293_s23  ;;  %v888_v18 = vadd.f32 %v874_v43, %v854_v50  ;;  %v968_v30 = vmul.f32 %v1260_v42, %v1665_v7  ;;  %v1929_v50 = vmul.f32 %v1523_v32, %v1665_v7 }
  0xe5   :  { %v1904_v24 = vpop.permute.xlu1 %731 }
  0xe6   :  { %v1909_v37 = vpop.permute.xlu0 %735 }
  0xe9   :  { %v794_v45 = vpop.permute.xlu2 %793 }
  0xea   :  { %v802_v49 = vadd.f32 %v794_v45, %v776_v35  ;;  %v803_v4 = vadd.f32 %v794_v45, %v777_v25 }
  0xec   :  { %v808_v28 = vadd.f32 %v802_v49, %v1639_v55  ;;  %v809_v61 = vadd.f32 %v803_v4, %v1639_v55  ;;  %v1933_v49 = vmul.f32 %v1520_v31, %v1665_v7 }
  0xed   :  { %v843_v8 = vpop.permute.xlu1 %842 }
  0xee   :  { %v1920_v46 = vpop.permute.xlu0 %846  ;;  %v814_v12 = vmax.f32 %v808_v28, 0.0  ;;  %v815_v29 = vmax.f32 %v809_v61, 0.0  ;;  %v944_v28 = vmul.f32 %v1523_v32, %v1688_v52  ;;  %v2201_v60 = vrot.slane %v1933_v49, 1 }
  0xf0   :  { %v820_v61 = vmul.f32 %v814_v12, %v1663_v11  ;;  %v965_v53 = vadd.f32 %v956_v54, %v944_v28 }
  0xf1   :  { %v905_v63 = vpop.permute.xlu2 %904 }
  0xf2   :  { %v913_v62 = vadd.f32 %v905_v63, %v887_v20  ;;  %v914_v47 = vadd.f32 %v905_v63, %v888_v18  ;;  %v1938_v18 = vmul.f32 %v1260_v42, %v1688_v52  ;;  %v821_v63 = vmul.f32 %v815_v29, %v1663_v11 }
  0xf4   :  { %v919_v35 = vadd.f32 %v913_v62, %v1644_v59  ;;  %v920_v25 = vadd.f32 %v914_v47, %v1644_v59  ;;  %v964_v56 = vadd.f32 %v956_v54, %v1938_v18 }
  0xf5   :  { %v954_v45 = vpop.permute.xlu1 %953 }
  0xf6   :  { %v925_v4 = vmax.f32 %v919_v35, 0.0  ;;  %v926_v43 = vmax.f32 %v920_v25, 0.0  ;;  %v1935_v20 = vpop.permute.xlu0 %957  ;;  %v1948_v35 = vrot.slane %v968_v30, 1  ;;  %v981_v25 = vrot.slane %v1929_v50, 1 }
  0xf8   :  { %v931_v62 = vmul.f32 %v925_v4, %v1756_v33  ;;  %v932_v47 = vmul.f32 %v926_v43, %v1756_v33  ;;  %v985_v11 = vsel %vm153_vm1, %v981_v25, %v2201_v60  ;;  %v998_v29 = vadd.f32 %v1948_v35, %v964_v56 }
  0xf9   :  { %v1946_v7 = vpop.permute.xlu2 %1066  ;;  %v999_v30 = vadd.f32 %v985_v11, %v965_v53  ;;  %v607_v53 = vadd.f32 %v1858_v6, %v1822_v23  ;;  %v608_v56 = vadd.f32 %v1858_v6, %v1824_v0  ;;  %v724_v23 = vmul.f32 %v1520_v31, %v1568_v44 }
  0xfa   :  { %v937_v26 = vadd.f32 %v931_v62, %v820_v61  ;;  %v938_v34 = vadd.f32 %v932_v47, %v821_v63  ;;  %v835_v0 = vmul.f32 %v1520_v31, %v1589_v14  ;;  %v2006_v44 = vmul.f32 %v1520_v31, %v1688_v52 }
  0xfb   :  { %v2207_v14 = vrot.slane %v1898_v21, 1  ;;  %v744_v52 = vadd.f32 %v1909_v37, %v1584_v58  ;;  %v2209_v21 = vrot.slane %v1867_v38, 1 }
  0xfd   :  { %v1953_v12 = vpop.permute.xlu1 %791 }
  0xfe   :  { %v1958_v33 = vpop.permute.xlu0 %795 }
 0x101   :  { %v1016_v4 = vpop.permute.xlu2 %1015 }
 0x102   :  { %v1024_v50 = vadd.f32 %v1016_v4, %v998_v29  ;;  %v1025_v43 = vadd.f32 %v1016_v4, %v999_v30  ;;  %v851_v30 = vadd.f32 %v843_v8, %v1609_v27 }
 0x104   :  { %v1030_v61 = vadd.f32 %v1024_v50, %v1748_v13  ;;  %v1031_v63 = vadd.f32 %v1025_v43, %v1748_v13  ;;  %v613_v43 = vmax.f32 %v607_v53, 0.0  ;;  %v886_v8 = vadd.f32 %v2207_v14, %v851_v30 }
 0x105   :  { %v1963_v62 = vpop.permute.xlu1 %902  ;;  %v2030_v14 = vmul.f32 %v1520_v31, %v1760_v1  ;;  %v885_v38 = vadd.f32 %v851_v30, %v1604_v9 }
 0x106   :  { %v1036_v54 = vmax.f32 %v1030_v61, 0.0  ;;  %v1037_v28 = vmax.f32 %v1031_v63, 0.0  ;;  %v1965_v47 = vpop.permute.xlu0 %906  ;;  %v614_v61 = vmax.f32 %v608_v56, 0.0  ;;  %v2208_v63 = vrot.slane %v1871_v48, 1 }
 0x107   :  { %v912_v56 = vadd.f32 %v1963_v62, %v886_v8  ;;  %v1080_v48 = vmul.f32 %v1523_v32, %v1760_v1  ;;  %v855_v8 = vadd.f32 %v1920_v46, %v1609_v27  ;;  %v2053_v27 = vadd.f32 %v1909_v37, %v724_v23 }
 0x108   :  { %v1042_v60 = vmul.f32 %v1036_v54, %v1829_v36  ;;  %v1043_v19 = vmul.f32 %v1037_v28, %v1829_v36  ;;  %v740_v36 = vadd.f32 %v1904_v24, %v1584_v58  ;;  %v2002_v24 = vadd.f32 %v1858_v6, %v1880_v22 }
 0x109   :  { %v1969_v5 = vpop.permute.xlu2 %1126  ;;  %v2016_v54 = vsel %vm153_vm1, %v2208_v63, %v1570_v51  ;;  %v889_v37 = vadd.f32 %v855_v8, %v1604_v9  ;;  %v856_v23 = vadd.f32 %v1920_v46, %v835_v0 }
 0x10a   :  { %v1975_v11 = vadd.f32 %v1042_v60, %v937_v26  ;;  %v1977_v29 = vadd.f32 %v1043_v19, %v938_v34  ;;  %v962_v60 = vadd.f32 %v954_v45, %v1938_v18  ;;  %v1990_v19 = vmul.f32 %v1260_v42, %v1780_v3 }
 0x10b   :  { %v1994_v26 = vmul.f32 %v1523_v32, %v1780_v3  ;;  %v1998_v34 = vadd.f32 %v1858_v6, %v1878_v41  ;;  %v1079_v41 = vmul.f32 %v1260_v42, %v1760_v1  ;;  %v775_v53 = vadd.f32 %v2209_v21, %v740_v36 }
 0x10c   :  { %v997_v42 = vadd.f32 %v981_v25, %v962_v60  ;;  %v966_v1 = vadd.f32 %v1935_v20, %v1938_v18 }
 0x10d   :  { %v1065_v4 = vpop.permute.xlu1 %1064  ;;  %v611_v58 = vmax.f32 %v1998_v34, 0.0  ;;  %v801_v63 = vadd.f32 %v1953_v12, %v775_v53  ;;  %v2043_v21 = vrot.slane %v1079_v41, 1  ;;  %v918_v53 = vadd.f32 %v912_v56, %v1644_v59  ;;  %v2215_v34 = vld [vmem:[#allocation10_spill] sm:$0xff] }
 0x10e   :  { %v1980_v50 = vpop.permute.xlu0 %1068  ;;  %v778_v41 = vadd.f32 %v744_v52, %v1570_v51  ;;  %v2211_v56 = vrot.slane %v1933_v49, 1  ;;  %v1000_v52 = vadd.f32 %v1948_v35, %v966_v1  ;;  %v996_v49 = vadd.f32 %v1948_v35, %v962_v60 }
 0x10f   :  { %v1077_v18 = vadd.f32 %v1980_v50, %v1990_v19 }
 0x111   :  { %v2010_v45 = vpop.permute.xlu2 %627  ;;  %v1111_v30 = vadd.f32 %v2043_v21, %v1077_v18 }
 0x112   :  { %v636_v22 = vmul.f32 %v2010_v45, %v613_v43  ;;  %v637_v28 = vmul.f32 %v2010_v45, %v614_v61 }
 0x114   :  { %v642_v43 = vadd.f32 %v636_v22, %v1783_v57  ;;  %v2034_v61 = vadd.f32 %v637_v28, %v1786_v16  ;;  %v2210_v57 = vrot.slane %v1902_v15, 1  ;;  %v774_v28 = vadd.f32 %v740_v36, %v1570_v51 }
 0x115   :  { %v1014_v32 = vpop.permute.xlu1 %1013  ;;  %v1092_v15 = vrot.slane %v1080_v48, 1  ;;  %v2071_v51 = vsel %vm153_vm1, %v2211_v56, %v1948_v35  ;;  %v924_v48 = vmax.f32 %v918_v53, 0.0 }
 0x116   :  { %v878_v16 = vsel %vm153_vm1, %v2210_v57, %v1604_v9  ;;  %v1023_v25 = vadd.f32 %v1014_v32, %v997_v42  ;;  %658 = vrot.lane.b32.xlu1 %v642_v43, %s1293_s23  ;;  %v2050_v22 = vpop.permute.xlu0 %1017  ;;  %v2202_v57 = vrot.slane %v2030_v14, 1  ;;  %v1073_v42 = vadd.f32 %v1065_v4, %v1990_v19 }
 0x117   :  { %v807_v43 = vadd.f32 %v801_v63, %v1639_v55  ;;  %v911_v4 = vadd.f32 %v1963_v62, %v885_v38  ;;  %v915_v63 = vadd.f32 %v1965_v47, %v889_v37  ;;  %v800_v9 = vadd.f32 %v1953_v12, %v774_v28 }
 0x118   :  { %v1029_v36 = vadd.f32 %v1023_v25, %v1748_v13  ;;  %v1096_v46 = vsel %vm153_vm1, %v1092_v15, %v2202_v57  ;;  %v1108_v0 = vadd.f32 %v1092_v15, %v1073_v42  ;;  %v804_v25 = vadd.f32 %v1958_v33, %v778_v41 }
 0x119   :  { %v813_v8 = vmax.f32 %v807_v43, 0.0  ;;  %v1026_v62 = vadd.f32 %v2050_v22, %v1000_v52  ;;  %v890_v53 = vadd.f32 %v878_v16, %v856_v23  ;;  %v1022_v37 = vadd.f32 %v1014_v32, %v996_v49 }
 0x11a   :  { %v1035_v1 = vmax.f32 %v1029_v36, 0.0  ;;  %v1107_v18 = vadd.f32 %v2043_v21, %v1073_v42  ;;  %v917_v28 = vadd.f32 %v911_v4, %v1644_v59  ;;  %v930_v57 = vmul.f32 %v924_v48, %v1740_v17 }
 0x11b   :  { %v921_v35 = vadd.f32 %v915_v63, %v1644_v59  ;;  %v1075_v41 = vadd.f32 %v1946_v7, %v1990_v19  ;;  %v806_v15 = vadd.f32 %v800_v9, %v1639_v55  ;;  %v819_v42 = vmul.f32 %v813_v8, %v1637_v2 }
 0x11c   :  { %v810_v43 = vadd.f32 %v804_v25, %v1639_v55  ;;  %v1041_v36 = vmul.f32 %v1035_v1, %v1811_v10  ;;  %v1032_v23 = vadd.f32 %v1026_v62, %v1748_v13  ;;  %v1076_v52 = vadd.f32 %v1946_v7, %v1994_v26 }
 0x11d   :  { %v1125_v38 = vpop.permute.xlu1 %1124  ;;  %v1057_v4 = vmul.f32 %v1520_v31, %v1780_v3  ;;  %v1028_v19 = vadd.f32 %v1022_v37, %v1748_v13  ;;  %v923_v63 = vmax.f32 %v917_v28, 0.0  ;;  %v936_v49 = vadd.f32 %v930_v57, %v819_v42 }
 0x11e   :  { %v1134_v56 = vadd.f32 %v1125_v38, %v1108_v0  ;;  %v2085_v12 = vpop.permute.xlu0 %1128  ;;  %v1133_v16 = vadd.f32 %v1125_v38, %v1107_v18  ;;  %v967_v0 = vadd.f32 %v1935_v20, %v2006_v44  ;;  %v1109_v8 = vadd.f32 %v2043_v21, %v1075_v41 }
 0x11f   :  { %v1137_v60 = vadd.f32 %v2085_v12, %v1111_v30  ;;  %v927_v30 = vmax.f32 %v921_v35, 0.0  ;;  %v812_v26 = vmax.f32 %v806_v15, 0.0  ;;  %v816_v1 = vmax.f32 %v810_v43, 0.0  ;;  %v2213_v15 = vld [vmem:[#allocation12_spill] sm:$0xff]  ;;  %v2216_v43 = vld [vmem:[#allocation11_spill] sm:$0xff] }
 0x120   :  { %v1140_v32 = vadd.f32 %v1134_v56, %v1858_v6  ;;  %v1139_v25 = vadd.f32 %v1133_v16, %v1858_v6  ;;  %v1038_v31 = vmax.f32 %v1032_v23, 0.0  ;;  %v1047_v62 = vadd.f32 %v1041_v36, %v936_v49 }
 0x121   :  { %v1143_v9 = vadd.f32 %v1137_v60, %v1858_v6  ;;  %v1110_v38 = vadd.f32 %v1096_v46, %v1076_v52  ;;  %v1034_v37 = vmax.f32 %v1028_v19, 0.0  ;;  %v2212_v57 = vmax.f32 %v2002_v24, 0.0 }
 0x122   :  { %v1146_v48 = vmax.f32 %v1140_v32, 0.0  ;;  %v929_v20 = vmul.f32 %v923_v63, %v1740_v17  ;;  %v933_v44 = vmul.f32 %v927_v30, %v1673_v39  ;;  %v1078_v60 = vadd.f32 %v1980_v50, %v1057_v4  ;;  %v2214_v32 = vld [vmem:[#allocation13_spill] sm:$0xff] }
 0x123   :  { %v1149_v28 = vmax.f32 %v1143_v9, 0.0  ;;  %v1145_v41 = vmax.f32 %v1139_v25, 0.0  ;;  %v818_v42 = vmul.f32 %v812_v26, %v1637_v2  ;;  %v1044_v24 = vmul.f32 %v1038_v31, %v2216_v43 }
 0x124   :  { %v1152_v7 = vmul.f32 %v1146_v48, %v1882_v40  ;;  %v2217_v17 = vrot.slane %v2030_v14, 1  ;;  %v1135_v50 = vadd.f32 %v1969_v5, %v1109_v8  ;;  %v1136_v23 = vadd.f32 %v1969_v5, %v1110_v38 }
 0x125   :  { %v626_v3 = vpop.permute.xlu1 %625  ;;  %v1040_v52 = vmul.f32 %v1034_v37, %v1811_v10  ;;  %v779_v2 = vadd.f32 %v2016_v54, %v2053_v27  ;;  %v1001_v4 = vadd.f32 %v2071_v51, %v967_v0  ;;  %v916_v19 = vadd.f32 %v1965_v47, %v890_v53 }
 0x126   :  { %v634_v18 = vmul.f32 %v626_v3, %v611_v58  ;;  %v635_v56 = vmul.f32 %v626_v3, %v2212_v57  ;;  %v1158_v35 = vadd.f32 %v1152_v7, %v1047_v62  ;;  %v822_v58 = vmul.f32 %v816_v1, %v2215_v34 }
 0x127   :  { %v1100_v36 = vsel %vm153_vm1, %v2217_v17, %v2043_v21  ;;  %v1155_v21 = vmul.f32 %v1149_v28, %v2010_v45  ;;  %v935_v63 = vadd.f32 %v929_v20, %v818_v42  ;;  %v1151_v5 = vmul.f32 %v1145_v41, %v1882_v40 }
 0x128   :  { %v640_v16 = vadd.f32 %v634_v18, %v2213_v15  ;;  %v641_v46 = vadd.f32 %v635_v56, %v2214_v32  ;;  %1171 = vrot.lane.b32.xlu1 %v1158_v35, %s1293_s23  ;;  %v939_v14 = vadd.f32 %v933_v44, %v822_v58  ;;  %v1112_v48 = vadd.f32 %v1100_v36, %v1078_v60 }
 0x129   :  { %v805_v10 = vadd.f32 %v1958_v33, %v779_v2  ;;  %v1141_v9 = vadd.f32 %v1135_v50, %v1858_v6  ;;  %v1142_v49 = vadd.f32 %v1136_v23, %v1858_v6  ;;  %v1027_v54 = vadd.f32 %v2050_v22, %v1001_v4 }
 0x12a   :  { %654 = vrot.lane.b32.xlu2 %v640_v16, %s1293_s23  ;;  %656 = vrot.lane.b32.xlu0 %v641_v46, %s1293_s23  ;;  %v1050_v30 = vadd.f32 %v1044_v24, %v939_v14  ;;  %v1046_v27 = vadd.f32 %v1040_v52, %v935_v63  ;;  %v922_v0 = vadd.f32 %v916_v19, %v1644_v59 }
 0x12b   :  { %v1138_v8 = vadd.f32 %v2085_v12, %v1112_v48  ;;  %v811_v40 = vadd.f32 %v805_v10, %v1639_v55  ;;  %v1147_v53 = vmax.f32 %v1141_v9, 0.0  ;;  %v1148_v33 = vmax.f32 %v1142_v49, 0.0 }
 0x12c   :  { %v1161_v51 = vadd.f32 %v1155_v21, %v1050_v30  ;;  %v1157_v47 = vadd.f32 %v1151_v5, %v1046_v27  ;;  %v1033_v25 = vadd.f32 %v1027_v54, %v1748_v13  ;;  %v928_v22 = vmax.f32 %v922_v0, 0.0 }
 0x12d   :  { %v1144_v7 = vadd.f32 %v1138_v8, %v1858_v6  ;;  %v1153_v59 = vmul.f32 %v1147_v53, %v626_v3  ;;  %v1154_v26 = vmul.f32 %v1148_v33, %v626_v3  ;;  %v817_v12 = vmax.f32 %v811_v40, 0.0 }
 0x12e   :  { %v1039_v1 = vmax.f32 %v1033_v25, 0.0  ;;  %v934_v31 = vmul.f32 %v928_v22, %v1673_v39 }
 0x12f   :  { %v1150_v62 = vmax.f32 %v1144_v7, 0.0  ;;  %v1159_v55 = vadd.f32 %v1153_v59, %v1975_v11  ;;  %v1160_v38 = vadd.f32 %v1154_v26, %v1977_v29  ;;  %v823_v13 = vmul.f32 %v817_v12, %v2215_v34 }
 0x130   :  { %1177 = vrot.lane.b32.xlu1 %v1161_v51, %s1293_s23 }
 0x131   :  { %v940_v6 = vadd.f32 %v934_v31, %v823_v13  ;;  %v1156_v3 = vmul.f32 %v1150_v62, %v2010_v45 }
 0x132   :  { %660 = vrot.lane.b32.xlu2 %v2034_v61, %s1293_s23  ;;  %1169 = vrot.lane.b32.xlu0 %v1157_v47, %s1293_s23  ;;  %v1045_v61 = vmul.f32 %v1039_v1, %v2216_v43  ;;  %v701_v47 = vstv %s2189_s2 }
 0x134   :  { %v1051_v37 = vadd.f32 %v1045_v61, %v940_v6 }
 0x136   :  { %v1162_v18 = vadd.f32 %v1156_v3, %v1051_v37 }
 0x13a   :  { %1173 = vrot.lane.b32.xlu2 %v1159_v55, %s1293_s23  ;;  %1175 = vrot.lane.b32.xlu0 %v1160_v38, %s1293_s23 }
 0x142   :  { %1179 = vrot.lane.b32.xlu2 %v1162_v18, %s1293_s23 }
 0x155   :  { %v653_v39 = vpop.permute.xlu1 %652  ;;  %v651_v57 = vpop.permute.xlu0 %650 }
 0x156   :  { %v663_v11 = vsel %vm662_vm2, %v651_v57, %v653_v39 }
 0x157   :  { %v670_v29 = vsel %vm669_vm3, %v663_v11, 0.0 }
 0x164   :  { %671 = vadd.xlane.f32.xlu0 %v670_v29 }
 0x184   :  { %v655_v56 = vpop.permute.xlu2 %654 }
 0x188   :  { %v659_v20 = vpop.permute.xlu1 %658 }
 0x18c   :  { %v661_v44 = vpop.permute.xlu2 %660 }
 0x18d   :  { %v665_v28 = vsel %vm662_vm2, %v659_v20, %v661_v44 }
 0x18e   :  { %v677_v45 = vsel %vm673_vm4, %v665_v28, 0.0 }
 0x18f   :  { %678 = vadd.xlane.f32.xlu2 %v677_v45 }
 0x194   :  { %v1174_v35 = vpop.permute.xlu2 %1173 }
 0x19a   :  { %v1172_v60 = vpop.permute.xlu1 %1171 }
 0x19c   :  { %v657_v41 = vpop.permute.xlu0 %656  ;;  %v1180_v32 = vpop.permute.xlu2 %1179 }
 0x19d   :  { %v664_v15 = vsel %vm662_vm2, %v655_v56, %v657_v41 }
 0x19e   :  { %v674_v16 = vsel %vm673_vm4, %v664_v15, 0.0 }
 0x19f   :  { %675 = vadd.xlane.f32.xlu1 %v674_v16 }
 0x1a2   :  { %v1178_v46 = vpop.permute.xlu1 %1177 }
 0x1a3   :  { %v1183_v34 = vsel %vm662_vm2, %v1178_v46, %v1180_v32 }
 0x1a4   :  { %v1170_v42 = vpop.permute.xlu0 %1169  ;;  %v1193_v43 = vsel %vm673_vm4, %v1183_v34, 0.0 }
 0x1a5   :  { %v1181_v58 = vsel %vm662_vm2, %v1170_v42, %v1172_v60 }
 0x1a6   :  { %v1187_v24 = vsel %vm669_vm3, %v1181_v58, 0.0 }
 0x1a7   :  { %1194 = vadd.xlane.f32.xlu1 %v1193_v43  ;;  %1188 = vadd.xlane.f32.xlu2 %v1187_v24 }
 0x1ac   :  { %v1176_v17 = vpop.permute.xlu0 %1175 }
 0x1ad   :  { %v1182_v36 = vsel %vm662_vm2, %v1174_v35, %v1176_v17 }
 0x1ae   :  { %v1190_v50 = vsel %vm673_vm4, %v1182_v36, 0.0 }
 0x1af   :  { %1191 = vadd.xlane.f32.xlu0 %v1190_v50 }
 0x1d7   :  { %v672_v23 = vpop.xlane.xlu0 %671 }
 0x1d8   :  { %v684_v4 = vrot.slane %v672_v23, 7 }
 0x202   :  { %v679_v52 = vpop.xlane.xlu2 %678 }
 0x203   :  { %v687_v14 = vrot.slane %v679_v52, 7 }
 0x205   :  { %v693_v5 = vsel %vm683_vm5, %v687_v14, 0.0 }
 0x212   :  { %v676_v2 = vpop.xlane.xlu1 %675 }
 0x213   :  { %v685_v21 = vrot.slane %v676_v2, 7 }
 0x215   :  { %v686_v19 = vsel %vm683_vm5, %v684_v4, %v685_v21  ;;  %v688_v48 = vsel %vm683_vm5, %v685_v21, %v687_v14 }
 0x216   :  { %v692_v63 = vadd.f32 %v688_v48, %v686_v19 }
 0x218   :  { %v694_v10 = vadd.f32 %v693_v5, %v692_v63 }
 0x21a   :  { %v695_v30 = vrot.slane %v694_v10, 4  ;;  %v1195_v27 = vpop.xlane.xlu1 %1194  ;;  %v1189_v51 = vpop.xlane.xlu2 %1188 }
 0x21b   :  { %v1202_v40 = vrot.slane %v1195_v27, 7  ;;  %v1199_v53 = vrot.slane %v1189_v51, 7 }
 0x21c   :  { %v696_v9 = vadd.f32 %v695_v30, %v694_v10 }
 0x21d   :  { %v1208_v12 = vsel %vm683_vm5, %v1202_v40, 0.0 }
 0x21e   :  { %v697_v49 = vrot.slane %v696_v9, 2 }
 0x220   :  { %v698_v54 = vadd.f32 %v697_v49, %v696_v9 }
 0x222   :  { %v699_v0 = vrot.slane %v698_v54, 1  ;;  %v1192_v8 = vpop.xlane.xlu0 %1191 }
 0x223   :  { %v1200_v33 = vrot.slane %v1192_v8, 7 }
 0x224   :  { %v700_v25 = vadd.f32 %v699_v0, %v698_v54 }
 0x225   :  { %v1201_v22 = vsel %vm683_vm5, %v1199_v53, %v1200_v33  ;;  %v1203_v7 = vsel %vm683_vm5, %v1200_v33, %v1202_v40 }
 0x226   :  { %v702_v59 = vadd.f32 %v701_v47, %v700_v25  ;;  %v1207_v26 = vadd.f32 %v1203_v7, %v1201_v22 }
 0x228   :  { %704 = vst.msk [vmem:[%s2192_s5] sm:$0x1] %vm703_vm6, %v702_v59  ;;  %v1209_v1 = vadd.f32 %v1208_v12, %v1207_v26 }
 0x22a   :  { %v1210_v31 = vrot.slane %v1209_v1, 4 }
 0x22c   :  { %v1211_v62 = vadd.f32 %v1210_v31, %v1209_v1 }
 0x22e   :  { %v1212_v55 = vrot.slane %v1211_v62, 2 }
 0x230   :  { %v1213_v38 = vadd.f32 %v1212_v55, %v1211_v62 }
 0x232   :  { %v1214_v13 = vrot.slane %v1213_v38, 1 }
 0x234   :  { %v1215_v61 = vadd.f32 %v1214_v13, %v1213_v38 }
 0x236   :  { %v1216_v6 = vadd.f32 %v1215_v61, %v701_v47 }
 0x238   :  { %1254 = vst.msk [vmem:[%s2192_s5 + $0x1] sm:$0x1] %vm703_vm6, %v1216_v6 }
 0x239   :  { %1223 = vsyncpa [#allocation5], 1 }
 0x23a   :  { %1224 = vsyncpa [#allocation7], 1 }

</bundles_post_ra>
